<compile_context>
chip_gen: v7x
topology: tpu7x:2x2x1
jax: 0.10.0
libtpu: 0.0.40
codegen_flags: <defaults>
</compile_context>

<pallas_src>
import functools
import math

import jax
import jax.numpy as jnp
from jax.experimental import pallas as pl
from jax.experimental.pallas import tpu as pltpu

LANE = 128
EPS = 0.1  # FAConv default eps


def _round_up(a, b):
    return ((a + b - 1) // b) * b


def faconv_kernel(a_ref, xk_ref, al_ref, ar_ref, x0_ref, linw_ref, linb_ref,
                  out_ref, acc_ref, *, eps):
    k = pl.program_id(1)

    @pl.when(k == 0)
    def _():
        acc_ref[...] = jnp.zeros_like(acc_ref)

    # gate[i, j] = tanh(alpha_r[i] + alpha_l[j]); computed on bf16 vregs
    # (bf16 EUP on v6e/v7x; v5e upcasts internally, still correct).
    gate = jnp.tanh((ar_ref[...] + al_ref[...]).astype(jnp.bfloat16))  # [Tn, Tk]
    msg = a_ref[...] * gate                         # bf16 * bf16, no f32 slab copy
    acc_ref[...] += jnp.dot(msg, xk_ref[...],       # bf16 x bf16 MXU, f32 accumulate
                            preferred_element_type=jnp.float32)

    @pl.when(k == pl.num_programs(1) - 1)
    def _():
        conv = acc_ref[...] + eps * x0_ref[...]
        act = jnp.maximum(conv, 0.0)                # ReLU
        out = jnp.dot(act, linw_ref[...],
                      preferred_element_type=jnp.float32) + linb_ref[...]
        out_ref[...] = out.astype(out_ref.dtype)


def faconv_gnn(x, x_0, a_norm, params, *, eps=EPS, tile_n=256, tile_k=1024):
    n, c = x.shape
    out_ch = params["lin_w"].shape[-1]

    # Clamp tiles to the (padded) problem size, preserving (8, 128) divisibility.
    tile_n = min(tile_n, _round_up(n, 8))
    tile_k = min(tile_k, _round_up(n, LANE))
    n_pad = _round_up(n, math.lcm(tile_n, tile_k))
    pad = n_pad - n
    grid = (n_pad // tile_n, n_pad // tile_k)

    # Hoisted per-node attention scalars (cheap O(N*C) in the wrapper; they were
    # grid-invariant recomputation inside the kernel).
    alpha_l = (x @ params["w_att_l"].T).T                          # [1, N]
    alpha_r = x @ params["w_att_r"]                                # [N, 1]

    a_bf16 = jnp.pad(a_norm, ((0, pad), (0, pad))).astype(jnp.bfloat16)
    x_bf16 = jnp.pad(x, ((0, pad), (0, 0))).astype(jnp.bfloat16)   # conv matmul RHS
    x0_p = jnp.pad(x_0, ((0, pad), (0, 0)))
    al_p = jnp.pad(alpha_l, ((0, 0), (0, pad)))
    ar_p = jnp.pad(alpha_r, ((0, pad), (0, 0)))

    # Lane-dense output: pad the final linear layer to a multiple of 128 lanes.
    out_pad = max(LANE, _round_up(out_ch, LANE))
    lin_w = jnp.zeros((c, out_pad), jnp.float32).at[:, :out_ch].set(params["lin_w"])
    lin_b = jnp.zeros((1, out_pad), jnp.float32).at[:, :out_ch].set(params["lin_b"])

    full = lambda i, k: (0, 0)
    rows = lambda i, k: (i, 0)

    flops = (2 * n_pad * n_pad * c          # message matmul (dominant)
             + 3 * n_pad * n_pad            # gate add + A*gate
             + 2 * n_pad * c * out_pad      # final linear
             + 4 * n_pad * c)
    transcendentals = n_pad * n_pad
    bytes_accessed = (2 * n_pad * n_pad     # bf16 adjacency stream (dominant)
                      + 2 * n_pad * c       # bf16 x
                      + 4 * n_pad * c       # f32 x_0
                      + 2 * n_pad * out_pad)  # bf16 padded output

    kernel = functools.partial(faconv_kernel, eps=eps)
    out = pl.pallas_call(
        kernel,
        out_shape=jax.ShapeDtypeStruct((n_pad, out_pad), jnp.bfloat16),
        grid_spec=pltpu.PrefetchScalarGridSpec(
            num_scalar_prefetch=0,
            grid=grid,
            in_specs=[
                pl.BlockSpec((tile_n, tile_k), lambda i, k: (i, k)),  # A slab (bf16)
                pl.BlockSpec((tile_k, c), lambda i, k: (k, 0)),       # x source slab (bf16)
                pl.BlockSpec((1, tile_k), lambda i, k: (0, k)),       # alpha_l slice
                pl.BlockSpec((tile_n, 1), rows),                      # alpha_r rows
                pl.BlockSpec((tile_n, c), rows),                      # x_0 rows (epilogue)
                pl.BlockSpec((c, out_pad), full),                     # padded linear weight
                pl.BlockSpec((1, out_pad), full),                     # padded linear bias
            ],
            out_specs=pl.BlockSpec((tile_n, out_pad), rows),
            scratch_shapes=[pltpu.VMEM((tile_n, c), jnp.float32)],    # f32 conv accumulator
        ),
        compiler_params=pltpu.CompilerParams(
            dimension_semantics=("parallel", "arbitrary"),  # rows across TCs; k reduction
            vmem_limit_bytes=48 * 1024 * 1024,              # sized against v7x 64 MiB VMEM
        ),
        cost_estimate=pl.CostEstimate(
            flops=flops,
            transcendentals=transcendentals,
            bytes_accessed=bytes_accessed,
        ),
    )(a_bf16, x_bf16, al_p, ar_p, x0_p, lin_w, lin_b)

    return out[:n, :out_ch].astype(jnp.float32)


def reference(x, x_0, a_norm, params, eps=EPS):
    """Pure-JAX f32 reference for the same forward pass."""
    alpha_l = x @ params["w_att_l"].T                 # [N, 1]
    alpha_r = x @ params["w_att_r"]                   # [N, 1]
    gate = jnp.tanh(alpha_r + alpha_l.T)              # gate[i, j] = tanh(a_r[i] + a_l[j])
    conv = (a_norm * gate) @ x + eps * x_0
    act = jnp.maximum(conv, 0.0)
    return act @ params["lin_w"] + params["lin_b"]


def build_normalized_adjacency(edge_index, edge_weight, num_nodes):
    """gcn_norm with add_self_loops (FAConv normalize=True) as dense [N, N]. Plain-JAX glue."""
    # TODO(synk): for genuinely sparse graphs, a scalar-prefetched gather kernel
    # would avoid streaming N^2 mostly-zero entries.
    src, dst = edge_index[0], edge_index[1]           # edge: src -> dst
    a = jnp.zeros((num_nodes, num_nodes), jnp.float32).at[dst, src].add(edge_weight)
    a = a + jnp.eye(num_nodes, dtype=jnp.float32)     # self loops (fill value 1)
    deg = a.sum(axis=1)
    dinv = jnp.where(deg > 0, jax.lax.rsqrt(deg), 0.0)
    return dinv[:, None] * a * dinv[None, :]


def init_params(key, in_ch, out_ch):
    k = jax.random.split(key, 4)

    def glorot(rng, shape):
        fan_in, fan_out = shape
        lim = jnp.sqrt(6.0 / (fan_in + fan_out))
        return jax.random.uniform(rng, shape, jnp.float32, -lim, lim)

    return {
        # FAConv.att_l / att_r : Linear(in_ch, 1, bias=False)
        "w_att_l": glorot(k[0], (1, in_ch)),
        "w_att_r": glorot(k[1], (in_ch, 1)),
        # nn.Linear(in_ch, out_ch)
        "lin_w": glorot(k[2], (in_ch, out_ch)),
        "lin_b": 0.1 * jax.random.normal(k[3], (1, out_ch), jnp.float32),
    }


if __name__ == "__main__":
    N, IN_CH, OUT_CH = 256, 16, 8

    key = jax.random.PRNGKey(0)
    kx, k0, kw, kp = jax.random.split(key, 4)

    x = jax.random.normal(kx, (N, IN_CH), jnp.float32)
    x_0 = jax.random.normal(k0, (N, IN_CH), jnp.float32)     # FAConv initial features

    # Deterministic undirected ring graph with symmetric random edge weights.
    idx = jnp.arange(N)
    nxt = (idx + 1) % N
    edge_index = jnp.stack([jnp.concatenate([idx, nxt]),
                            jnp.concatenate([nxt, idx])], axis=0)
    w_half = jax.random.uniform(kw, (N,), jnp.float32, 0.5, 1.5)
    edge_weight = jnp.concatenate([w_half, w_half])

    a_norm = build_normalized_adjacency(edge_index, edge_weight, N)
    params = init_params(kp, IN_CH, OUT_CH)

    out = faconv_gnn(x, x_0, a_norm, params)
    out = jax.block_until_ready(out)

    ref = reference(x, x_0, a_norm, params)
    assert out.shape == (N, OUT_CH)
    # bf16 A / gate / x operands and bf16 writeback vs pure-f32 reference.
    assert jnp.allclose(out, ref, atol=5e-2, rtol=5e-2), "mismatch vs JAX reference"

    print("KERNEL_OK")
</pallas_src>

<mosaic_0001>
module attributes {stable_mosaic.version = 11 : i64} {
  func.func @faconv_kernel(%arg0: i32, %arg1: i32, %arg2: memref<256x256xbf16, #tpu.memory_space<vmem>>, %arg3: memref<256x16xbf16, #tpu.memory_space<vmem>>, %arg4: memref<1x256xf32, #tpu.memory_space<vmem>>, %arg5: memref<256x1xf32, #tpu.memory_space<vmem>>, %arg6: memref<256x16xf32, #tpu.memory_space<vmem>>, %arg7: memref<16x128xf32, #tpu.memory_space<vmem>>, %arg8: memref<1x128xf32, #tpu.memory_space<vmem>>, %arg9: memref<256x128xbf16, #tpu.memory_space<vmem>>, %arg10: memref<256x16xf32, #tpu.memory_space<vmem>>) attributes {dimension_semantics = [#tpu.dimension_semantics<parallel>, #tpu.dimension_semantics<arbitrary>], iteration_bounds = array<i64: 1, 1>, scalar_prefetch = 0 : i64, scratch_operands = 1 : i64, tpu.core_type = #tpu.core_type<tc>, window_params = [{transform_indices = @transform_0, window_bounds = array<i64: 256, 256>}, {transform_indices = @transform_1, window_bounds = array<i64: 256, 16>}, {transform_indices = @transform_2, window_bounds = array<i64: 1, 256>}, {transform_indices = @transform_3, window_bounds = array<i64: 256, 1>}, {transform_indices = @transform_4, window_bounds = array<i64: 256, 16>}, {pipeline_mode = #tpu.pipeline_mode<synchronous>, transform_indices = @transform_5, window_bounds = array<i64: 16, 128>}, {pipeline_mode = #tpu.pipeline_mode<synchronous>, transform_indices = @transform_6, window_bounds = array<i64: 1, 128>}, {transform_indices = @transform_7, window_bounds = array<i64: 256, 128>}]} {
    %c0_i32 = arith.constant 0 : i32
    %0 = arith.cmpi eq, %arg1, %c0_i32 : i32
    %1 = arith.extui %0 : i1 to i32
    %c0_i32_0 = arith.constant 0 : i32
    %2 = arith.cmpi ne, %1, %c0_i32_0 : i32
    scf.if %2 {
      %cst_14 = arith.constant 0.000000e+00 : f32
      %20 = vector.broadcast %cst_14 : f32 to vector<256x16xf32>
      %c0_15 = arith.constant 0 : index
      %c0_16 = arith.constant 0 : index
      %21 = vector.load %arg10[%c0_15, %c0_16] : memref<256x16xf32, #tpu.memory_space<vmem>>, vector<256x16xf32>
      tpu.vector_store %arg10[%c0_15, %c0_16], %20 {strides = array<i32>} : memref<256x16xf32, #tpu.memory_space<vmem>>, vector<256x16xf32>,
    } else {
    }
    %c0 = arith.constant 0 : index
    %c0_1 = arith.constant 0 : index
    %3 = vector.load %arg5[%c0, %c0_1] : memref<256x1xf32, #tpu.memory_space<vmem>>, vector<256x1xf32>
    %c0_2 = arith.constant 0 : index
    %c0_3 = arith.constant 0 : index
    %4 = vector.load %arg4[%c0_2, %c0_3] : memref<1x256xf32, #tpu.memory_space<vmem>>, vector<1x256xf32>
    %5 = vector.broadcast %3 : vector<256x1xf32> to vector<256x256xf32>
    %6 = vector.broadcast %4 : vector<1x256xf32> to vector<256x256xf32>
    %7 = arith.addf %5, %6 : vector<256x256xf32>
    %8 = arith.truncf %7 : vector<256x256xf32> to vector<256x256xbf16>
    %9 = math.tanh %8 : vector<256x256xbf16>
    %c0_4 = arith.constant 0 : index
    %c0_5 = arith.constant 0 : index
    %10 = vector.load %arg2[%c0_4, %c0_5] : memref<256x256xbf16, #tpu.memory_space<vmem>>, vector<256x256xbf16>
    %11 = arith.mulf %10, %9 : vector<256x256xbf16>
    %c0_6 = arith.constant 0 : index
    %c0_7 = arith.constant 0 : index
    %12 = vector.load %arg10[%c0_6, %c0_7] : memref<256x16xf32, #tpu.memory_space<vmem>>, vector<256x16xf32>
    %c0_8 = arith.constant 0 : index
    %c0_9 = arith.constant 0 : index
    %13 = vector.load %arg3[%c0_8, %c0_9] : memref<256x16xbf16, #tpu.memory_space<vmem>>, vector<256x16xbf16>
    %cst = arith.constant dense<0.000000e+00> : vector<256x16xf32>
    %14 = tpu.matmul %11, %13, %cst {dimension_numbers = #tpu.dot_dimension_numbers<[1], [0], [0], [1], [0, 0, 1, 1], [], []>} : vector<256x256xbf16>, vector<256x16xbf16>, vector<256x16xf32> -> vector<256x16xf32>
    %15 = arith.addf %12, %14 : vector<256x16xf32>
    %c0_10 = arith.constant 0 : index
    %c0_11 = arith.constant 0 : index
    %16 = vector.load %arg10[%c0_10, %c0_11] : memref<256x16xf32, #tpu.memory_space<vmem>>, vector<256x16xf32>
    tpu.vector_store %arg10[%c0_10, %c0_11], %15 {strides = array<i32>} : memref<256x16xf32, #tpu.memory_space<vmem>>, vector<256x16xf32>,
    %c0_i32_12 = arith.constant 0 : i32
    %17 = arith.cmpi eq, %arg1, %c0_i32_12 : i32
    %18 = arith.extui %17 : i1 to i32
    %c0_i32_13 = arith.constant 0 : i32
    %19 = arith.cmpi ne, %18, %c0_i32_13 : i32
    scf.if %19 {
      %c0_14 = arith.constant 0 : index
      %c0_15 = arith.constant 0 : index
      %20 = vector.load %arg10[%c0_14, %c0_15] : memref<256x16xf32, #tpu.memory_space<vmem>>, vector<256x16xf32>
      %c0_16 = arith.constant 0 : index
      %c0_17 = arith.constant 0 : index
      %21 = vector.load %arg6[%c0_16, %c0_17] : memref<256x16xf32, #tpu.memory_space<vmem>>, vector<256x16xf32>
      %cst_18 = arith.constant 1.000000e-01 : f32
      %22 = vector.broadcast %cst_18 : f32 to vector<256x16xf32>
      %23 = arith.mulf %22, %21 : vector<256x16xf32>
      %24 = arith.addf %20, %23 : vector<256x16xf32>
      %cst_19 = arith.constant 0.000000e+00 : f32
      %25 = vector.broadcast %cst_19 : f32 to vector<256x16xf32>
      %26 = arith.maximumf %24, %25 : vector<256x16xf32>
      %c0_20 = arith.constant 0 : index
      %c0_21 = arith.constant 0 : index
      %27 = vector.load %arg7[%c0_20, %c0_21] : memref<16x128xf32, #tpu.memory_space<vmem>>, vector<16x128xf32>
      %cst_22 = arith.constant dense<0.000000e+00> : vector<256x128xf32>
      %28 = tpu.matmul %26, %27, %cst_22 {dimension_numbers = #tpu.dot_dimension_numbers<[1], [0], [0], [1], [0, 0, 1, 1], [], []>} : vector<256x16xf32>, vector<16x128xf32>, vector<256x128xf32> -> vector<256x128xf32>
      %c0_23 = arith.constant 0 : index
      %c0_24 = arith.constant 0 : index
      %29 = vector.load %arg8[%c0_23, %c0_24] : memref<1x128xf32, #tpu.memory_space<vmem>>, vector<1x128xf32>
      %30 = vector.broadcast %29 : vector<1x128xf32> to vector<256x128xf32>
      %31 = arith.addf %28, %30 : vector<256x128xf32>
      %32 = arith.truncf %31 : vector<256x128xf32> to vector<256x128xbf16>
      %c0_25 = arith.constant 0 : index
      %c0_26 = arith.constant 0 : index
      %33 = vector.load %arg9[%c0_25, %c0_26] : memref<256x128xbf16, #tpu.memory_space<vmem>>, vector<256x128xbf16>
      tpu.vector_store %arg9[%c0_25, %c0_26], %32 {strides = array<i32>} : memref<256x128xbf16, #tpu.memory_space<vmem>>, vector<256x128xbf16>,
    } else {
    }
    return
  }
  func.func @transform_0(%arg0: i32, %arg1: i32) -> (i32, i32) {
    %c0_i32 = arith.constant 0 : i32
    return %arg0, %arg1 : i32, i32
  }
  func.func @transform_1(%arg0: i32, %arg1: i32) -> (i32, i32) {
    %c0_i32 = arith.constant 0 : i32
    %c0_i32_0 = arith.constant 0 : i32
    return %arg1, %c0_i32 : i32, i32
  }
  func.func @transform_2(%arg0: i32, %arg1: i32) -> (i32, i32) {
    %c0_i32 = arith.constant 0 : i32
    %c0_i32_0 = arith.constant 0 : i32
    return %c0_i32, %arg1 : i32, i32
  }
  func.func @transform_3(%arg0: i32, %arg1: i32) -> (i32, i32) {
    %c0_i32 = arith.constant 0 : i32
    %c0_i32_0 = arith.constant 0 : i32
    return %arg0, %c0_i32 : i32, i32
  }
  func.func @transform_4(%arg0: i32, %arg1: i32) -> (i32, i32) {
    %c0_i32 = arith.constant 0 : i32
    %c0_i32_0 = arith.constant 0 : i32
    return %arg0, %c0_i32 : i32, i32
  }
  func.func @transform_5(%arg0: i32, %arg1: i32) -> (i32, i32) {
    %c0_i32 = arith.constant 0 : i32
    %c0_i32_0 = arith.constant 0 : i32
    %c0_i32_1 = arith.constant 0 : i32
    return %c0_i32, %c0_i32_0 : i32, i32
  }
  func.func @transform_6(%arg0: i32, %arg1: i32) -> (i32, i32) {
    %c0_i32 = arith.constant 0 : i32
    %c0_i32_0 = arith.constant 0 : i32
    %c0_i32_1 = arith.constant 0 : i32
    return %c0_i32, %c0_i32_0 : i32, i32
  }
  func.func @transform_7(%arg0: i32, %arg1: i32) -> (i32, i32) {
    %c0_i32 = arith.constant 0 : i32
    %c0_i32_0 = arith.constant 0 : i32
    return %arg0, %c0_i32 : i32, i32
  }
}

</mosaic_0001>

<bundles_post_ra>
// kernel: tpu_custom_call.1
= control target key start
LH: loop header
LB: loop body
LE: loop exit
PB: predicated region body
PF: predicated region fallthrough
CT: control target
= control target key end

     0   :  { %v2437_v2 = vmov 0   ;;  %s3143_s0 = inlined_call_operand.vmem [shape: bf16[256,256], index: 0, kind: input, shape index: {}]   ;;  %s3144_s1 = inlined_call_operand.vmem [shape: bf16[256,16], index: 1, kind: input, shape index: {}]   ;;  %s3145_s2 = inlined_call_operand.vmem [shape: f32[1,256], index: 2, kind: input, shape index: {}]   ;;  %s3146_s3 = inlined_call_operand.vmem [shape: f32[256,1], index: 3, kind: input, shape index: {}]   ;;  %s3147_s4 = inlined_call_operand.vmem [shape: f32[256,16], index: 4, kind: input, shape index: {}]   ;;  %s3148_s5 = inlined_call_operand.vmem [shape: f32[16,128], index: 5, kind: input, shape index: {}]   ;;  %s3149_s6 = inlined_call_operand.vmem [shape: f32[1,128], index: 6, kind: input, shape index: {}]   ;;  %s3150_s7 = inlined_call_operand.hbm [shape: bf16[256,128], index: 7, kind: output, shape index: {}]  }
   0x1   :  { %v67_v0 = vld [vmem:[%s3146_s3 + $0x10] sm:$0xff]  ;;  %v65_v1 = vld [vmem:[%s3146_s3] sm:$0xff]  ;;  %2332 = vset.pattern.permute.xlu1 %v2437_v2  ;;  %2331 = vset.pattern.permute.xlu0 %v2437_v2  ;;  %v68_v3 = vld [vmem:[%s3146_s3 + $0x18] sm:$0xff] }
   0x2   :  { %110 = vperm.xlu1 %2332, %v67_v0   ;;  %100 = vperm.xlu0 %2331, %v65_v1   ;;  %v66_v4 = vld [vmem:[%s3146_s3 + $0x8] sm:$0xff]  ;;  %v69_v6 = vld [vmem:[%s3146_s3 + $0x20] sm:$0xff]  ;;  %v72_v7 = vld [vmem:[%s3146_s3 + $0x38] sm:$0xff] }
   0x3   :  { %v70_v5 = vld [vmem:[%s3146_s3 + $0x28] sm:$0xff]  ;;  %v71_v8 = vld [vmem:[%s3146_s3 + $0x30] sm:$0xff]  ;;  %v2333_v9 = vld [vmem:[%s3144_s1 + $0x40] sm:$0xff]  }
   0x4   :  { %v2334_v10 = vld [vmem:[%s3144_s1] sm:$0xff]   ;;  %v74_v11 = vld [vmem:[%s3146_s3 + $0x48] sm:$0xff]  ;;  %2108 = vmatprep.subr.bf16.mxu0 %v2333_v9  ;;  %2310 = vmatprep.subr.bf16.mxu1 %v2333_v9  ;;  %v2337_v15 = vld [vmem:[%s3144_s1 + $0x50] sm:$0xff]  }
   0x5   :  { %v2335_v12 = vld [vmem:[%s3144_s1 + $0x48] sm:$0xff]   ;;  %v73_v13 = vld [vmem:[%s3146_s3 + $0x40] sm:$0xff]  ;;  %2109 = vmatpush3.bf16.msra.mxu0 %v2334_v10  ;;  %2318 = vmatpush3.bf16.msra.mxu1 %v2334_v10  ;;  %v76_v16 = vld [vmem:[%s3146_s3 + $0x58] sm:$0xff] }
   0x6   :  { %115 = vperm.xlu1 %2332, %v68_v3   ;;  %105 = vperm.xlu0 %2331, %v66_v4   ;;  %v2336_v14 = vld [vmem:[%s3144_s1 + $0x8] sm:$0xff]   ;;  %v75_v17 = vld [vmem:[%s3146_s3 + $0x50] sm:$0xff]  ;;  %v2339_v19 = vld [vmem:[%s3144_s1 + $0x58] sm:$0xff]  }
   0x7   :  { %2110 = vmatprep.subr.bf16.mxu0 %v2335_v12  ;;  %2311 = vmatprep.subr.bf16.mxu1 %v2335_v12  ;;  %v2338_v18 = vld [vmem:[%s3144_s1 + $0x10] sm:$0xff]   ;;  %v78_v20 = vld [vmem:[%s3146_s3 + $0x68] sm:$0xff]  ;;  %v77_v21 = vld [vmem:[%s3146_s3 + $0x60] sm:$0xff] }
   0x8   :  { %v2340_v22 = vld [vmem:[%s3144_s1 + $0x18] sm:$0xff]   ;;  %v2341_v23 = vld [vmem:[%s3144_s1 + $0x60] sm:$0xff]   ;;  %v79_v25 = vld [vmem:[%s3146_s3 + $0x70] sm:$0xff] }
   0x9   :  { %2111 = vmatpush3.bf16.msra.mxu0 %v2336_v14  ;;  %2319 = vmatpush3.bf16.msra.mxu1 %v2336_v14  ;;  %v80_v24 = vld [vmem:[%s3146_s3 + $0x78] sm:$0xff]  ;;  %v2342_v26 = vld [vmem:[%s3144_s1 + $0x20] sm:$0xff]  }
   0xa   :  { %125 = vperm.xlu1 %2332, %v70_v5   ;;  %120 = vperm.xlu0 %2331, %v69_v6  }
   0xb   :  { %2112 = vmatprep.subr.bf16.mxu0 %v2337_v15  ;;  %2312 = vmatprep.subr.bf16.mxu1 %v2337_v15 }
   0xd   :  { %2113 = vmatpush3.bf16.msra.mxu0 %v2338_v18  ;;  %2320 = vmatpush3.bf16.msra.mxu1 %v2338_v18 }
   0xe   :  { %135 = vperm.xlu1 %2332, %v72_v7   ;;  %130 = vperm.xlu0 %2331, %v71_v8  }
   0xf   :  { %2114 = vmatprep.subr.bf16.mxu0 %v2339_v19  ;;  %2313 = vmatprep.subr.bf16.mxu1 %v2339_v19 }
  0x11   :  { %2115 = vmatpush3.bf16.msra.mxu0 %v2340_v22  ;;  %2321 = vmatpush3.bf16.msra.mxu1 %v2340_v22 }
  0x12   :  { %145 = vperm.xlu1 %2332, %v74_v11   ;;  %140 = vperm.xlu0 %2331, %v73_v13  }
  0x16   :  { %155 = vperm.xlu1 %2332, %v76_v16   ;;  %150 = vperm.xlu0 %2331, %v75_v17  }
  0x1a   :  { %165 = vperm.xlu1 %2332, %v78_v20   ;;  %160 = vperm.xlu0 %2331, %v77_v21  }
  0x1b   :  { %12 = vsyncpa [#allocation4], 0  ;;  %2116 = vmatprep.subr.bf16.mxu0 %v2341_v23  ;;  %v2343_v27 = vld [vmem:[%s3144_s1 + $0x68] sm:$0xff]   ;;  %2314 = vmatprep.subr.bf16.mxu1 %v2341_v23  ;;  %v81_v29 = vld [vmem:[%s3146_s3 + $0x80] sm:$0xff]  ;;  %v259_v49 = vlaneseq  ;;  %vm32_vm0 = vcmask 130048  }
  0x1c   :  { %v82_v28 = vld [vmem:[%s3146_s3 + $0x88] sm:$0xff]  ;;  %2117 = vmatpush3.bf16.msra.mxu0 %v2342_v26  ;;  %2322 = vmatpush3.bf16.msra.mxu1 %v2342_v26  ;;  %v2345_v31 = vld [vmem:[%s3144_s1 + $0x70] sm:$0xff]   ;;  %v84_v32 = vld [vmem:[%s3146_s3 + $0x98] sm:$0xff] }
  0x1d   :  { %v2344_v30 = vld [vmem:[%s3144_s1 + $0x28] sm:$0xff]   ;;  %2118 = vmatprep.subr.bf16.mxu0 %v2343_v27  ;;  %2315 = vmatprep.subr.bf16.mxu1 %v2343_v27  ;;  %v83_v33 = vld [vmem:[%s3146_s3 + $0x90] sm:$0xff]  ;;  %v2347_v35 = vld [vmem:[%s3144_s1 + $0x78] sm:$0xff]   ;;  %v260_v50 = vshrl.u32 %v259_v49, 7 }
  0x1e   :  { %175 = vperm.xlu1 %2332, %v80_v24   ;;  %170 = vperm.xlu0 %2331, %v79_v25   ;;  %v2346_v34 = vld [vmem:[%s3144_s1 + $0x30] sm:$0xff]   ;;  %v86_v36 = vld [vmem:[%s3146_s3 + $0xa8] sm:$0xff]  ;;  %v85_v37 = vld [vmem:[%s3146_s3 + $0xa0] sm:$0xff] }
  0x1f   :  { %v2348_v38 = vld [vmem:[%s3144_s1 + $0x38] sm:$0xff]   ;;  %v90_v39 = vld [vmem:[%s3146_s3 + $0xc8] sm:$0xff]  ;;  %v89_v40 = vld [vmem:[%s3146_s3 + $0xc0] sm:$0xff]  ;;  %v261_v51 = vsub.s32 0, %v260_v50  ;;  %v265_v53 = vsub.s32 1, %v260_v50 }
  0x20   :  { %2119 = vmatpush3.bf16.msra.mxu0 %v2344_v30  ;;  %2323 = vmatpush3.bf16.msra.mxu1 %v2344_v30  ;;  %v88_v41 = vld [vmem:[%s3146_s3 + $0xb8] sm:$0xff]  ;;  %v87_v42 = vld [vmem:[%s3146_s3 + $0xb0] sm:$0xff]  ;;  %v94_v45 = vld [vmem:[%s3146_s3 + $0xe8] sm:$0xff] }
  0x21   :  { %2120 = vmatprep.subr.bf16.mxu0 %v2345_v31  ;;  %2316 = vmatprep.subr.bf16.mxu1 %v2345_v31  ;;  %v92_v43 = vld [vmem:[%s3146_s3 + $0xd8] sm:$0xff]  ;;  %v91_v44 = vld [vmem:[%s3146_s3 + $0xd0] sm:$0xff]  ;;  %v93_v46 = vld [vmem:[%s3146_s3 + $0xe0] sm:$0xff] }
  0x22   :  { %185 = vperm.xlu1 %2332, %v82_v28   ;;  %180 = vperm.xlu0 %2331, %v81_v29   ;;  %v96_v47 = vld [vmem:[%s3146_s3 + $0xf8] sm:$0xff]  ;;  %v95_v48 = vld [vmem:[%s3146_s3 + $0xf0] sm:$0xff]  ;;  %v97_v52 = vld [vmem:[%s3145_s2] sm:$0x3] }
  0x23   :  { %v2629_v54 = vrot.slane %v97_v52, %v261_v51  ;;  %v2631_v57 = vrot.slane %v97_v52, %v265_v53 }
  0x24   :  { %2121 = vmatpush3.bf16.msra.mxu0 %v2346_v34  ;;  %2324 = vmatpush3.bf16.msra.mxu1 %v2346_v34 }
  0x25   :  { %2122 = vmatprep.subr.bf16.mxu0 %v2347_v35  ;;  %2317 = vmatprep.subr.bf16.mxu1 %v2347_v35 }
  0x26   :  { %195 = vperm.xlu1 %2332, %v84_v32   ;;  %190 = vperm.xlu0 %2331, %v83_v33  }
  0x28   :  { %2123 = vmatpush3.bf16.msra.mxu0 %v2348_v38  ;;  %2325 = vmatpush3.bf16.msra.mxu1 %v2348_v38  ;;  %v398_v38 = vld [vmem:[%s3143_s0 + $0x8] sm:$0xff] }
  0x2a   :  { %205 = vperm.xlu1 %2332, %v86_v36   ;;  %200 = vperm.xlu0 %2331, %v85_v37   ;;  %v397_v37 = vld [vmem:[%s3143_s0] sm:$0xff] }
  0x2e   :  { %225 = vperm.xlu1 %2332, %v90_v39   ;;  %220 = vperm.xlu0 %2331, %v89_v40   ;;  %v399_v39 = vld [vmem:[%s3143_s0 + $0x10] sm:$0xff] }
  0x32   :  { %215 = vperm.xlu1 %2332, %v88_v41   ;;  %210 = vperm.xlu0 %2331, %v87_v42  }
  0x36   :  { %235 = vperm.xlu1 %2332, %v92_v43   ;;  %230 = vperm.xlu0 %2331, %v91_v44  }
  0x3a   :  { %245 = vperm.xlu1 %2332, %v94_v45   ;;  %240 = vperm.xlu0 %2331, %v93_v46   ;;  %v400_v45 = vld [vmem:[%s3143_s0 + $0x18] sm:$0xff] }
  0x3e   :  { %255 = vperm.xlu1 %2332, %v96_v47   ;;  %250 = vperm.xlu0 %2331, %v95_v48  }
  0x81   :  { %v111_v55 = vpop.permute.xlu1 %110  ;;  %v101_v56 = vpop.permute.xlu0 %100 }
  0x82   :  { %v273_v58 = vadd.f32 %v2629_v54, %v111_v55  ;;  %v274_v59 = vadd.f32 %v2631_v57, %v111_v55  ;;  %v269_v60 = vadd.f32 %v2629_v54, %v101_v56  ;;  %v270_v3 = vadd.f32 %v2631_v57, %v101_v56 }
  0x85   :  { %v116_v61 = vpop.permute.xlu1 %115  ;;  %v106_v62 = vpop.permute.xlu0 %105 }
  0x86   :  { %v275_v63 = vadd.f32 %v2629_v54, %v116_v61  ;;  %v276_v0 = vadd.f32 %v2631_v57, %v116_v61  ;;  %v271_v1 = vadd.f32 %v2629_v54, %v106_v62  ;;  %v272_v2 = vadd.f32 %v2631_v57, %v106_v62 }
  0x88   :  { %v335_v4 = vpack.c.bf16 %v275_v63, %v273_v58  ;;  %v336_v5 = vpack.c.bf16 %v276_v0, %v274_v59  ;;  %v333_v6 = vpack.c.bf16 %v271_v1, %v269_v60  ;;  %v334_v7 = vpack.c.bf16 %v272_v2, %v270_v3 }
  0x89   :  { %v126_v8 = vpop.permute.xlu1 %125  ;;  %v121_v9 = vpop.permute.xlu0 %120 }
  0x8a   :  { %2349 = vtanh.bf16 %v335_v4  ;;  %v279_v10 = vadd.f32 %v2629_v54, %v126_v8  ;;  %v280_v11 = vadd.f32 %v2631_v57, %v126_v8  ;;  %v277_v12 = vadd.f32 %v2629_v54, %v121_v9 }
  0x8b   :  { %2351 = vtanh.bf16 %v336_v5  ;;  %v278_v13 = vadd.f32 %v2631_v57, %v121_v9 }
  0x8c   :  { %2353 = vtanh.bf16 %v333_v6  ;;  %v337_v14 = vpack.c.bf16 %v279_v10, %v277_v12  ;;  %v401_v6 = vld [vmem:[%s3143_s0 + $0x20] sm:$0xff] }
  0x8d   :  { %2355 = vtanh.bf16 %v334_v7  ;;  %v338_v15 = vpack.c.bf16 %v280_v11, %v278_v13  ;;  %v136_v16 = vpop.permute.xlu1 %135  ;;  %v131_v17 = vpop.permute.xlu0 %130  ;;  %v402_v7 = vld [vmem:[%s3143_s0 + $0x28] sm:$0xff] }
  0x8e   :  { %2357 = vtanh.bf16 %v337_v14  ;;  %v283_v18 = vadd.f32 %v2629_v54, %v136_v16  ;;  %v281_v19 = vadd.f32 %v2629_v54, %v131_v17  ;;  %v284_v20 = vadd.f32 %v2631_v57, %v136_v16 }
  0x8f   :  { %2359 = vtanh.bf16 %v338_v15  ;;  %v282_v21 = vadd.f32 %v2631_v57, %v131_v17 }
  0x90   :  { %v339_v24 = vpack.c.bf16 %v283_v18, %v281_v19 }
  0x91   :  { %v146_v22 = vpop.permute.xlu1 %145  ;;  %v141_v23 = vpop.permute.xlu0 %140  ;;  %v340_v26 = vpack.c.bf16 %v284_v20, %v282_v21 }
  0x92   :  { %v287_v30 = vadd.f32 %v2629_v54, %v146_v22  ;;  %v285_v31 = vadd.f32 %v2629_v54, %v141_v23  ;;  %v288_v33 = vadd.f32 %v2631_v57, %v146_v22  ;;  %v286_v34 = vadd.f32 %v2631_v57, %v141_v23 }
  0x93   :  { %2361 = vtanh.bf16 %v339_v24 }
  0x94   :  { %2363 = vtanh.bf16 %v340_v26  ;;  %v341_v46 = vpack.c.bf16 %v287_v30, %v285_v31  ;;  %v342_v48 = vpack.c.bf16 %v288_v33, %v286_v34  ;;  %v403_v34 = vld [vmem:[%s3143_s0 + $0x30] sm:$0xff] }
  0x95   :  { %v2350_v25 = vpop.eup %2349  ;;  %v156_v27 = vpop.permute.xlu1 %155 }
  0x96   :  { %v151_v28 = vpop.permute.xlu0 %150  ;;  %v2352_v29 = vpop.eup %2351  ;;  %v291_v53 = vadd.f32 %v2629_v54, %v156_v27  ;;  %v292_v58 = vadd.f32 %v2631_v57, %v156_v27  ;;  %2365 = vtanh.bf16 %v341_v46 }
  0x97   :  { %v2354_v32 = vpop.eup %2353  ;;  %v1838_v35 = vcombine.low %v2350_v25, %v2352_v29  ;;  %v1839_v40 = vcombine.high %v2350_v25, %v2352_v29  ;;  %v289_v55 = vadd.f32 %v2629_v54, %v151_v28  ;;  %v290_v59 = vadd.f32 %v2631_v57, %v151_v28 }
  0x98   :  { %v2356_v36 = vpop.eup %2355  ;;  %2367 = vtanh.bf16 %v342_v48 }
  0x99   :  { %v166_v41 = vpop.permute.xlu1 %165  ;;  %v1836_v43 = vcombine.low %v2354_v32, %v2356_v36  ;;  %v1837_v44 = vcombine.high %v2354_v32, %v2356_v36  ;;  %v2358_v47 = vpop.eup %2357  ;;  %v591_v51 = vmul.bf16 %v1838_v35, %v399_v39  ;;  %v592_v56 = vmul.bf16 %v1839_v40, %v400_v45  ;;  %v404_v35 = vld [vmem:[%s3143_s0 + $0x38] sm:$0xff] }
  0x9a   :  { %v161_v42 = vpop.permute.xlu0 %160  ;;  %v2360_v52 = vpop.eup %2359  ;;  %v343_v3 = vpack.c.bf16 %v291_v53, %v289_v55  ;;  %v295_v4 = vadd.f32 %v2629_v54, %v166_v41  ;;  %v344_v8 = vpack.c.bf16 %v292_v58, %v290_v59  ;;  %v296_v9 = vadd.f32 %v2631_v57, %v166_v41 }
  0x9b   :  { %v589_v49 = vmul.bf16 %v1836_v43, %v397_v37  ;;  %v590_v50 = vmul.bf16 %v1837_v44, %v398_v38  ;;  %v1871_v0 = vcombine.high %v591_v51, %v592_v56  ;;  %v1840_v1 = vcombine.low %v2358_v47, %v2360_v52 }
  0x9c   :  { %v1841_v2 = vcombine.high %v2358_v47, %v2360_v52  ;;  %v293_v5 = vadd.f32 %v2629_v54, %v161_v42  ;;  %v294_v10 = vadd.f32 %v2631_v57, %v161_v42  ;;  %2369 = vtanh.bf16 %v343_v3 }
  0x9d   :  { %v1869_v60 = vcombine.high %v589_v49, %v590_v50  ;;  %v176_v61 = vpop.permute.xlu1 %175  ;;  %v1868_v62 = vcombine.low %v589_v49, %v590_v50  ;;  %v2683_v14 = vmul.bf16 %v1840_v1, %v401_v6  ;;  %2371 = vtanh.bf16 %v344_v8  ;;  %v406_v8 = vld [vmem:[%s3143_s0 + $0x48] sm:$0xff] }
  0x9e   :  { %v171_v63 = vpop.permute.xlu0 %170  ;;  %v2362_v13 = vpop.eup %2361  ;;  %v2685_v15 = vmul.bf16 %v1841_v2, %v402_v7  ;;  %v345_v17 = vpack.c.bf16 %v295_v4, %v293_v5  ;;  %v346_v18 = vpack.c.bf16 %v296_v9, %v294_v10  ;;  %v299_v19 = vadd.f32 %v2629_v54, %v176_v61  ;;  %v405_v7 = vld [vmem:[%s3143_s0 + $0x40] sm:$0xff] }
  0x9f   :  { %973 = vmatprep.mubr.bf16.mxu0 %v1869_v60  ;;  %v2364_v16 = vpop.eup %2363  ;;  %v297_v20 = vadd.f32 %v2629_v54, %v171_v63  ;;  %v1870_v25 = vcombine.low %v591_v51, %v592_v56  ;;  %v300_v31 = vadd.f32 %v2631_v57, %v176_v61  ;;  %v298_v32 = vadd.f32 %v2631_v57, %v171_v63 }
  0xa0   :  { %974 = vmatmul.mubr.bf16.vlgmr.msra.gmra.mrb[0].mxu0 %v1868_v62  ;;  %v1873_v28 = vcombine.high %v2683_v14, %v2685_v15  ;;  %v1842_v29 = vcombine.low %v2362_v13, %v2364_v16  ;;  %v1843_v30 = vcombine.high %v2362_v13, %v2364_v16  ;;  %2373 = vtanh.bf16 %v345_v17 }
  0xa1   :  { %981 = vmatprep.mubr.bf16.mxu0 %v1871_v0  ;;  %v2679_v11 = vpop.permute.xlu1 %185  ;;  %v2366_v36 = vpop.eup %2365  ;;  %2375 = vtanh.bf16 %v346_v18  ;;  %v347_v37 = vpack.c.bf16 %v299_v19, %v297_v20  ;;  %v348_v48 = vpack.c.bf16 %v300_v31, %v298_v32  ;;  %v1872_v55 = vcombine.low %v2683_v14, %v2685_v15 }
  0xa2   :  { %v2681_v12 = vpop.permute.xlu0 %180  ;;  %v2707_v46 = vmul.bf16 %v1842_v29, %v403_v34  ;;  %v2709_v47 = vmul.bf16 %v1843_v30, %v404_v35  ;;  %v303_v49 = vadd.f32 %v2629_v54, %v2679_v11  ;;  %v304_v3 = vadd.f32 %v2631_v57, %v2679_v11  ;;  %v408_v34 = vld [vmem:[%s3143_s0 + $0x58] sm:$0xff] }
  0xa3   :  { %v2368_v41 = vpop.eup %2367  ;;  %v301_v50 = vadd.f32 %v2629_v54, %v2681_v12  ;;  %v302_v4 = vadd.f32 %v2631_v57, %v2681_v12 }
  0xa4   :  { %v1844_v58 = vcombine.low %v2366_v36, %v2368_v41  ;;  %v1875_v0 = vcombine.high %v2707_v46, %v2709_v47  ;;  %v1845_v1 = vcombine.high %v2366_v36, %v2368_v41 }
  0xa5   :  { %v196_v21 = vpop.permute.xlu1 %195  ;;  %v349_v5 = vpack.c.bf16 %v303_v49, %v301_v50  ;;  %v350_v20 = vpack.c.bf16 %v304_v3, %v302_v4 }
  0xa6   :  { %v191_v22 = vpop.permute.xlu0 %190  ;;  %v307_v23 = vadd.f32 %v2629_v54, %v196_v21  ;;  %v308_v24 = vadd.f32 %v2631_v57, %v196_v21  ;;  %v2739_v17 = vmul.bf16 %v1844_v58, %v405_v7  ;;  %v2741_v18 = vmul.bf16 %v1845_v1, %v406_v8 }
  0xa7   :  { %v305_v26 = vadd.f32 %v2629_v54, %v191_v22  ;;  %v306_v27 = vadd.f32 %v2631_v57, %v191_v22  ;;  %v2370_v62 = vpop.eup %2369 }
  0xa8   :  { %982 = vmatmul.mubr.bf16.gmra.mrb[4].mxu0 %v1870_v25  ;;  %v2372_v2 = vpop.eup %2371  ;;  %v1874_v25 = vcombine.low %v2707_v46, %v2709_v47  ;;  %v1877_v36 = vcombine.high %v2739_v17, %v2741_v18  ;;  %v415_v46 = vld [vmem:[%s3143_s0 + $0x90] sm:$0xff]  ;;  %v416_v47 = vld [vmem:[%s3143_s0 + $0x98] sm:$0xff] }
  0xa9   :  { %v351_v33 = vpack.c.bf16 %v307_v23, %v305_v26  ;;  %v352_v38 = vpack.c.bf16 %v308_v24, %v306_v27  ;;  %989 = vmatprep.mubr.bf16.mxu0 %v1873_v28  ;;  %v206_v39 = vpop.permute.xlu1 %205  ;;  %v1846_v27 = vcombine.low %v2370_v62, %v2372_v2  ;;  %v1847_v28 = vcombine.high %v2370_v62, %v2372_v2 }
  0xaa   :  { %v201_v40 = vpop.permute.xlu0 %200  ;;  %v311_v42 = vadd.f32 %v2629_v54, %v206_v39  ;;  %v312_v43 = vadd.f32 %v2631_v57, %v206_v39 }
  0xab   :  { %2377 = vtanh.bf16 %v351_v33  ;;  %v309_v44 = vadd.f32 %v2629_v54, %v201_v40  ;;  %v310_v45 = vadd.f32 %v2631_v57, %v201_v40  ;;  %v2736_v15 = vpop.eup %2373  ;;  %v407_v33 = vld [vmem:[%s3143_s0 + $0x50] sm:$0xff] }
  0xac   :  { %2379 = vtanh.bf16 %v352_v38  ;;  %v2743_v19 = vpop.eup %2375 }
  0xad   :  { %v353_v51 = vpack.c.bf16 %v311_v42, %v309_v44  ;;  %2381 = vtanh.bf16 %v347_v37  ;;  %v354_v52 = vpack.c.bf16 %v312_v43, %v310_v45  ;;  %v226_v53 = vpop.permute.xlu1 %225  ;;  %v2761_v44 = vmul.bf16 %v1846_v27, %v407_v33 }
  0xae   :  { %v221_v56 = vpop.permute.xlu0 %220  ;;  %v319_v59 = vadd.f32 %v2629_v54, %v226_v53  ;;  %v320_v60 = vadd.f32 %v2631_v57, %v226_v53  ;;  %v2763_v45 = vmul.bf16 %v1847_v28, %v408_v34  ;;  %v1849_v4 = vcombine.high %v2736_v15, %v2743_v19  ;;  %v419_v34 = vld [vmem:[%s3143_s0 + $0xb0] sm:$0xff] }
  0xaf   :  { %2383 = vtanh.bf16 %v353_v51  ;;  %v317_v61 = vadd.f32 %v2629_v54, %v221_v56  ;;  %v318_v63 = vadd.f32 %v2631_v57, %v221_v56  ;;  %v1848_v56 = vcombine.low %v2736_v15, %v2743_v19 }
  0xb0   :  { %2385 = vtanh.bf16 %v354_v52  ;;  %990 = vmatmul.mubr.bf16.gmra.mrb[8].mxu0 %v1872_v55  ;;  %v1876_v55 = vcombine.low %v2739_v17, %v2741_v18  ;;  %v1879_v3 = vcombine.high %v2761_v44, %v2763_v45  ;;  %v410_v18 = vld [vmem:[%s3143_s0 + $0x68] sm:$0xff] }
  0xb1   :  { %v357_v6 = vpack.c.bf16 %v319_v59, %v317_v61  ;;  %2387 = vtanh.bf16 %v348_v48  ;;  %v358_v9 = vpack.c.bf16 %v320_v60, %v318_v63  ;;  %997 = vmatprep.mubr.bf16.mxu0 %v1875_v0  ;;  %v216_v10 = vpop.permute.xlu1 %215 }
  0xb2   :  { %v211_v13 = vpop.permute.xlu0 %210  ;;  %v315_v11 = vadd.f32 %v2629_v54, %v216_v10  ;;  %v316_v12 = vadd.f32 %v2631_v57, %v216_v10 }
  0xb3   :  { %2389 = vtanh.bf16 %v357_v6  ;;  %v313_v14 = vadd.f32 %v2629_v54, %v211_v13  ;;  %v314_v16 = vadd.f32 %v2631_v57, %v211_v13  ;;  %v421_v13 = vld [vmem:[%s3143_s0 + $0xc0] sm:$0xff] }
  0xb4   :  { %2391 = vtanh.bf16 %v358_v9 }
  0xb5   :  { %2393 = vtanh.bf16 %v349_v5  ;;  %v355_v21 = vpack.c.bf16 %v315_v11, %v313_v14  ;;  %v356_v23 = vpack.c.bf16 %v316_v12, %v314_v16  ;;  %v236_v24 = vpop.permute.xlu1 %235  ;;  %v417_v5 = vld [vmem:[%s3143_s0 + $0xa0] sm:$0xff]  ;;  %v422_v11 = vld [vmem:[%s3143_s0 + $0xc8] sm:$0xff] }
  0xb6   :  { %v2378_v22 = vpop.eup %2377  ;;  %v231_v26 = vpop.permute.xlu0 %230  ;;  %v323_v30 = vadd.f32 %v2629_v54, %v236_v24  ;;  %v324_v31 = vadd.f32 %v2631_v57, %v236_v24  ;;  %v418_v12 = vld [vmem:[%s3143_s0 + $0xa8] sm:$0xff] }
  0xb7   :  { %v2380_v29 = vpop.eup %2379  ;;  %2395 = vtanh.bf16 %v355_v21  ;;  %v321_v32 = vadd.f32 %v2629_v54, %v231_v26  ;;  %v322_v35 = vadd.f32 %v2631_v57, %v231_v26 }
  0xb8   :  { %2397 = vtanh.bf16 %v356_v23  ;;  %v2759_v37 = vpop.eup %2381  ;;  %998 = vmatmul.mubr.bf16.gmra.mrb[12].mxu0 %v1874_v25  ;;  %v1854_v39 = vcombine.low %v2378_v22, %v2380_v29  ;;  %v1855_v48 = vcombine.high %v2378_v22, %v2380_v29  ;;  %v602_v29 = vmul.bf16 %v1849_v4, %v410_v18 }
  0xb9   :  { %2399 = vtanh.bf16 %v350_v20  ;;  %v359_v38 = vpack.c.bf16 %v323_v30, %v321_v32  ;;  %v360_v41 = vpack.c.bf16 %v324_v31, %v322_v35  ;;  %1005 = vmatprep.mubr.bf16.mxu0 %v1877_v36  ;;  %v246_v42 = vpop.permute.xlu1 %245  ;;  %v420_v35 = vld [vmem:[%s3143_s0 + $0xb8] sm:$0xff] }
  0xba   :  { %v2384_v40 = vpop.eup %2383  ;;  %v241_v43 = vpop.permute.xlu0 %240  ;;  %v327_v50 = vadd.f32 %v2629_v54, %v246_v42  ;;  %v328_v51 = vadd.f32 %v2631_v57, %v246_v42  ;;  %v2781_v60 = vmul.bf16 %v1854_v39, %v415_v46  ;;  %v2783_v61 = vmul.bf16 %v1855_v48, %v416_v47  ;;  %v424_v46 = vld [vmem:[%s3143_s0 + $0xd8] sm:$0xff] }
  0xbb   :  { %v2386_v49 = vpop.eup %2385  ;;  %2401 = vtanh.bf16 %v359_v38  ;;  %v325_v52 = vadd.f32 %v2629_v54, %v241_v43  ;;  %v326_v53 = vadd.f32 %v2631_v57, %v241_v43  ;;  %v423_v43 = vld [vmem:[%s3143_s0 + $0xd0] sm:$0xff] }
  0xbc   :  { %2403 = vtanh.bf16 %v360_v41  ;;  %v2779_v58 = vpop.eup %2387  ;;  %v1856_v62 = vcombine.low %v2384_v40, %v2386_v49  ;;  %v1857_v6 = vcombine.high %v2384_v40, %v2386_v49  ;;  %v1887_v20 = vcombine.high %v2781_v60, %v2783_v61 }
  0xbd   :  { %v361_v59 = vpack.c.bf16 %v327_v50, %v325_v52  ;;  %v362_v0 = vpack.c.bf16 %v328_v51, %v326_v53  ;;  %v256_v1 = vpop.permute.xlu1 %255  ;;  %v1886_v21 = vcombine.low %v2781_v60, %v2783_v61  ;;  %v1878_v41 = vcombine.low %v2761_v44, %v2763_v45  ;;  %v411_v52 = vld [vmem:[%s3143_s0 + $0x70] sm:$0xff]  ;;  %v412_v53 = vld [vmem:[%s3143_s0 + $0x78] sm:$0xff]  ;;  %v1330_v60 = vld [vmem:[%s3148_s5] sm:$0xff] }
  0xbe   :  { %v2390_v63 = vpop.eup %2389  ;;  %v251_v2 = vpop.permute.xlu0 %250  ;;  %v331_v8 = vadd.f32 %v2629_v54, %v256_v1  ;;  %v332_v9 = vadd.f32 %v2631_v57, %v256_v1  ;;  %v2817_v22 = vmul.bf16 %v1856_v62, %v417_v5  ;;  %v2819_v26 = vmul.bf16 %v1857_v6, %v418_v12  ;;  %v425_v1 = vld [vmem:[%s3143_s0 + $0xe0] sm:$0xff]  ;;  %v1331_v61 = vld [vmem:[%s3148_s5 + $0x8] sm:$0xff] }
  0xbf   :  { %v2392_v7 = vpop.eup %2391  ;;  %2405 = vtanh.bf16 %v361_v59  ;;  %v329_v10 = vadd.f32 %v2629_v54, %v251_v2  ;;  %v330_v15 = vadd.f32 %v2631_v57, %v251_v2  ;;  %v409_v54 = vld [vmem:[%s3143_s0 + $0x60] sm:$0xff]  ;;  %v1850_v47 = vcombine.low %v2759_v37, %v2779_v58  ;;  %v426_v2 = vld [vmem:[%s3143_s0 + $0xe8] sm:$0xff] }
  0xc0   :  { %v2804_v14 = vpop.eup %2393  ;;  %2407 = vtanh.bf16 %v362_v0  ;;  %v1860_v16 = vcombine.low %v2390_v63, %v2392_v7  ;;  %v1861_v17 = vcombine.high %v2390_v63, %v2392_v7  ;;  %1006 = vmatmul.mubr.bf16.gmra.mrb[16].mxu0 %v1876_v55  ;;  %v601_v28 = vmul.bf16 %v1848_v56, %v409_v54 }
  0xc1   :  { %v363_v19 = vpack.c.bf16 %v331_v8, %v329_v10  ;;  %v364_v23 = vpack.c.bf16 %v332_v9, %v330_v15  ;;  %1013 = vmatprep.mubr.bf16.mxu0 %v1879_v3  ;;  %v1889_v33 = vcombine.high %v2817_v22, %v2819_v26  ;;  %v1888_v36 = vcombine.low %v2817_v22, %v2819_v26  ;;  %v427_v15 = vld [vmem:[%s3143_s0 + $0xf0] sm:$0xff] }
  0xc2   :  { %v2396_v57 = vpop.eup %2395  ;;  %v613_v24 = vmul.bf16 %v1860_v16, %v421_v13  ;;  %v614_v25 = vmul.bf16 %v1861_v17, %v422_v11  ;;  %v1851_v48 = vcombine.high %v2759_v37, %v2779_v58  ;;  %v1881_v44 = vcombine.high %v601_v28, %v602_v29  ;;  %v428_v16 = vld [vmem:[%s3143_s0 + $0xf8] sm:$0xff] }
  0xc3   :  { %v2398_v27 = vpop.eup %2397  ;;  %2409 = vtanh.bf16 %v363_v19  ;;  %v603_v63 = vmul.bf16 %v1850_v47, %v411_v52  ;;  %v1880_v13 = vcombine.low %v601_v28, %v602_v29 }
  0xc4   :  { %v2821_v30 = vpop.eup %2399  ;;  %2411 = vtanh.bf16 %v364_v23  ;;  %v1893_v31 = vcombine.high %v613_v24, %v614_v25  ;;  %v1892_v32 = vcombine.low %v613_v24, %v614_v25  ;;  %v1858_v38 = vcombine.low %v2396_v57, %v2398_v27 }
  0xc5   :  { %v1859_v39 = vcombine.high %v2396_v57, %v2398_v27  ;;  %v604_v0 = vmul.bf16 %v1851_v48, %v412_v53  ;;  %v1852_v11 = vcombine.low %v2804_v14, %v2821_v30  ;;  %v1853_v12 = vcombine.high %v2804_v14, %v2821_v30  ;;  %v413_v57 = vld [vmem:[%s3143_s0 + $0x80] sm:$0xff]  ;;  %v414_v14 = vld [vmem:[%s3143_s0 + $0x88] sm:$0xff] }
  0xc6   :  { %v2402_v40 = vpop.eup %2401  ;;  %1069 = vmatprep.mubr.bf16.mxu1 %v1893_v31  ;;  %v2845_v49 = vmul.bf16 %v1858_v38, %v419_v34 }
  0xc7   :  { %v2404_v42 = vpop.eup %2403  ;;  %1070 = vmatmul.mubr.bf16.vlgmr.msra.gmra.mrb[0].mxu1 %v1892_v32  ;;  %v2847_v50 = vmul.bf16 %v1859_v39, %v420_v35  ;;  %v1883_v17 = vcombine.high %v603_v63, %v604_v0  ;;  %v605_v25 = vmul.bf16 %v1852_v11, %v413_v57  ;;  %v606_v27 = vmul.bf16 %v1853_v12, %v414_v14 }
  0xc8   :  { %v1862_v45 = vcombine.low %v2402_v40, %v2404_v42  ;;  %v1863_v51 = vcombine.high %v2402_v40, %v2404_v42  ;;  %1014 = vmatmul.mubr.bf16.gmra.mrb[20].mxu0 %v1878_v41  ;;  %v1882_v30 = vcombine.low %v603_v63, %v604_v0  ;;  %v2438_v35 = vmov 0.0   ;;  %v1204_v63 = vld [vmem:[%s3147_s4 + $0x10] sm:$0xff] }
  0xc9   :  { %v1891_v55 = vcombine.high %v2845_v49, %v2847_v50  ;;  %v1890_v37 = vcombine.low %v2845_v49, %v2847_v50  ;;  %1021 = vmatprep.mubr.bf16.mxu0 %v1881_v44  ;;  %v1885_v31 = vcombine.high %v605_v25, %v606_v27  ;;  %v1884_v34 = vcombine.low %v605_v25, %v606_v27  ;;  %v1203_v49 = vld [vmem:[%s3147_s4 + $0x8] sm:$0xff] }
  0xca   :  { %v2406_v56 = vpop.eup %2405  ;;  %v615_v58 = vmul.bf16 %v1862_v45, %v423_v43  ;;  %v616_v59 = vmul.bf16 %v1863_v51, %v424_v46  ;;  %33 = vst.msk [vmem:[#allocation2] sm:$0xff] %vm32_vm0, %v2438_v35  ;;  %34 = vst.msk [vmem:[#allocation2 + $0x8] sm:$0xff] %vm32_vm0, %v2438_v35  ;;  %v1202_v43 = vld [vmem:[%s3147_s4] sm:$0xff]  ;;  %v1207_v27 = vld [vmem:[%s3147_s4 + $0x28] sm:$0xff] }
  0xcb   :  { %v2408_v62 = vpop.eup %2407  ;;  %35 = vst.msk [vmem:[#allocation2 + $0x10] sm:$0xff] %vm32_vm0, %v2438_v35  ;;  %36 = vst.msk [vmem:[#allocation2 + $0x18] sm:$0xff] %vm32_vm0, %v2438_v35  ;;  %v1234_v45 = vmul.f32 0.1, %v1202_v43 }
  0xcc   :  { %v1895_v3 = vcombine.high %v615_v58, %v616_v59  ;;  %v1894_v4 = vcombine.low %v615_v58, %v616_v59  ;;  %v1864_v5 = vcombine.low %v2406_v56, %v2408_v62  ;;  %v1865_v6 = vcombine.high %v2406_v56, %v2408_v62  ;;  %37 = vst.msk [vmem:[#allocation2 + $0x20] sm:$0xff] %vm32_vm0, %v2438_v35 }
  0xcd   :  { %38 = vst.msk [vmem:[#allocation2 + $0x28] sm:$0xff] %vm32_vm0, %v2438_v35  ;;  %39 = vst.msk [vmem:[#allocation2 + $0x30] sm:$0xff] %vm32_vm0, %v2438_v35 }
  0xce   :  { %v2410_v7 = vpop.eup %2409  ;;  %1077 = vmatprep.mubr.bf16.mxu1 %v1895_v3  ;;  %v617_v8 = vmul.bf16 %v1864_v5, %v425_v1  ;;  %v618_v9 = vmul.bf16 %v1865_v6, %v426_v2  ;;  %40 = vst.msk [vmem:[#allocation2 + $0x38] sm:$0xff] %vm32_vm0, %v2438_v35  ;;  %41 = vst.msk [vmem:[#allocation2 + $0x40] sm:$0xff] %vm32_vm0, %v2438_v35  ;;  %v1205_v5 = vld [vmem:[%s3147_s4 + $0x18] sm:$0xff] }
  0xcf   :  { %v2412_v10 = vpop.eup %2411  ;;  %1078 = vmatmul.mubr.bf16.gmra.mrb[4].mxu1 %v1894_v4  ;;  %42 = vst.msk [vmem:[#allocation2 + $0x48] sm:$0xff] %vm32_vm0, %v2438_v35  ;;  %43 = vst.msk [vmem:[#allocation2 + $0x50] sm:$0xff] %vm32_vm0, %v2438_v35 }
  0xd0   :  { %v1897_v54 = vcombine.high %v617_v8, %v618_v9  ;;  %v1866_v18 = vcombine.low %v2410_v7, %v2412_v10  ;;  %v1867_v19 = vcombine.high %v2410_v7, %v2412_v10  ;;  %1022 = vmatmul.mubr.bf16.gmra.mrb[24].mxu0 %v1880_v13  ;;  %v1896_v28 = vcombine.low %v617_v8, %v618_v9 }
  0xd1   :  { %1029 = vmatprep.mubr.bf16.mxu0 %v1883_v17  ;;  %44 = vst.msk [vmem:[#allocation2 + $0x58] sm:$0xff] %vm32_vm0, %v2438_v35  ;;  %45 = vst.msk [vmem:[#allocation2 + $0x60] sm:$0xff] %vm32_vm0, %v2438_v35  ;;  %v621_v22 = vld [vmem:[#allocation2] sm:$0xff]  ;;  %v622_v38 = vld [vmem:[#allocation2 + $0x8] sm:$0xff]  ;;  %v1236_v9 = vmul.f32 0.1, %v1204_v63 }
  0xd2   :  { %1085 = vmatprep.mubr.bf16.mxu1 %v1897_v54  ;;  %v619_v23 = vmul.bf16 %v1866_v18, %v427_v15  ;;  %v620_v24 = vmul.bf16 %v1867_v19, %v428_v16  ;;  %46 = vst.msk [vmem:[#allocation2 + $0x68] sm:$0xff] %vm32_vm0, %v2438_v35  ;;  %47 = vst.msk [vmem:[#allocation2 + $0x70] sm:$0xff] %vm32_vm0, %v2438_v35  ;;  %v623_v47 = vld [vmem:[#allocation2 + $0x10] sm:$0xff]  ;;  %v624_v51 = vld [vmem:[#allocation2 + $0x18] sm:$0xff]  ;;  %v1237_v15 = vmul.f32 0.1, %v1205_v5 }
  0xd3   :  { %48 = vst.msk [vmem:[#allocation2 + $0x78] sm:$0xff] %vm32_vm0, %v2438_v35  ;;  %49 = vst.msk [vmem:[#allocation2 + $0x80] sm:$0xff] %vm32_vm0, %v2438_v35  ;;  %v625_v3 = vld [vmem:[#allocation2 + $0x20] sm:$0xff] }
  0xd4   :  { %v1899_v29 = vcombine.high %v619_v23, %v620_v24  ;;  %v1898_v32 = vcombine.low %v619_v23, %v620_v24  ;;  %50 = vst.msk [vmem:[#allocation2 + $0x88] sm:$0xff] %vm32_vm0, %v2438_v35  ;;  %51 = vst.msk [vmem:[#allocation2 + $0x90] sm:$0xff] %vm32_vm0, %v2438_v35  ;;  %v626_v10 = vld [vmem:[#allocation2 + $0x28] sm:$0xff]  ;;  %v1206_v19 = vld [vmem:[%s3147_s4 + $0x20] sm:$0xff] }
  0xd5   :  { %52 = vst.msk [vmem:[#allocation2 + $0x98] sm:$0xff] %vm32_vm0, %v2438_v35  ;;  %53 = vst.msk [vmem:[#allocation2 + $0xa0] sm:$0xff] %vm32_vm0, %v2438_v35  ;;  %v627_v24 = vld [vmem:[#allocation2 + $0x30] sm:$0xff] }
  0xd6   :  { %54 = vst.msk [vmem:[#allocation2 + $0xa8] sm:$0xff] %vm32_vm0, %v2438_v35  ;;  %55 = vst.msk [vmem:[#allocation2 + $0xb0] sm:$0xff] %vm32_vm0, %v2438_v35 }
  0xd7   :  { %1086 = vmatmul.mubr.bf16.gmra.mrb[8].mxu1 %v1896_v28  ;;  %56 = vst.msk [vmem:[#allocation2 + $0xb8] sm:$0xff] %vm32_vm0, %v2438_v35  ;;  %57 = vst.msk [vmem:[#allocation2 + $0xc0] sm:$0xff] %vm32_vm0, %v2438_v35 }
  0xd8   :  { %1093 = vmatprep.mubr.bf16.mxu1 %v1899_v29  ;;  %1030 = vmatmul.mubr.bf16.gmra.mrb[28].mxu0 %v1882_v30  ;;  %58 = vst.msk [vmem:[#allocation2 + $0xc8] sm:$0xff] %vm32_vm0, %v2438_v35  ;;  %59 = vst.msk [vmem:[#allocation2 + $0xd0] sm:$0xff] %vm32_vm0, %v2438_v35 }
  0xd9   :  { %1037 = vmatprep.mubr.bf16.mxu0 %v1885_v31  ;;  %60 = vst.msk [vmem:[#allocation2 + $0xd8] sm:$0xff] %vm32_vm0, %v2438_v35  ;;  %61 = vst.msk [vmem:[#allocation2 + $0xe0] sm:$0xff] %vm32_vm0, %v2438_v35  ;;  %v1238_v31 = vmul.f32 0.1, %v1206_v19 }
  0xda   :  { %62 = vst.msk [vmem:[#allocation2 + $0xe8] sm:$0xff] %vm32_vm0, %v2438_v35  ;;  %63 = vst.msk [vmem:[#allocation2 + $0xf0] sm:$0xff] %vm32_vm0, %v2438_v35 }
  0xdb   :  { %64 = vst.msk [vmem:[#allocation2 + $0xf8] sm:$0xff] %vm32_vm0, %v2438_v35 }
  0xdf   :  { %1094 = vmatmul.mubr.bf16.gmra.mrb[12].mxu1 %v1898_v32  ;;  %v628_v32 = vld [vmem:[#allocation2 + $0x38] sm:$0xff] }
  0xe0   :  { %1038 = vmatmul.mubr.bf16.gmra.mrb[32].mxu0 %v1884_v34 }
  0xe1   :  { %1045 = vmatprep.mubr.bf16.mxu0 %v1887_v20  ;;  %v2306_v20 = vpack.c.bf16 %v1331_v61, %v1330_v60  ;;  %v1239_v61 = vmul.f32 0.1, %v1207_v27  ;;  %v1212_v27 = vld [vmem:[%s3147_s4 + $0x50] sm:$0xff] }
  0xe3   :  { %2307 = vmatprep.subr.bf16.mxu1 %v2306_v20 }
  0xe4   :  { %2309 = vmatpush3.bf16.msra.mxu1 %v2306_v20 }
  0xe8   :  { %1046 = vmatmul.mubr.bf16.gmra.mrb[36].mxu0 %v1886_v21 }
  0xe9   :  { %1053 = vmatprep.mubr.bf16.mxu0 %v1889_v33 }
  0xf0   :  { %1054 = vmatmul.mubr.bf16.gmra.mrb[40].mxu0 %v1888_v36 }
  0xf1   :  { %1061 = vmatprep.mubr.bf16.mxu0 %v1891_v55 }
  0xf8   :  { %1062 = vmatmul.mubr.bf16.gmra.mrb[44].mxu0 %v1890_v37  ;;  %v1235_v37 = vmul.f32 0.1, %v1203_v49  ;;  %v630_v49 = vld [vmem:[#allocation2 + $0x48] sm:$0xff] }
 0x173   :  { %v2124_v21 = vpop.f32.mrb[0].mxu0 }
 0x174   :  { %v2125_v26 = vpop.f32.mrb[1].mxu0 }
 0x175   :  { %v2126_v33 = vadd.f32 %v2125_v26, %v2124_v21  ;;  %v2127_v36 = vpop.f32.mrb[2].mxu0 }
 0x176   :  { %v2128_v39 = vpop.f32.mrb[3].mxu0 }
 0x177   :  { %v1102_v40 = vadd.f32 %v2126_v33, %v621_v22  ;;  %v2129_v41 = vadd.f32 %v2128_v39, %v2127_v36  ;;  %v1208_v33 = vld [vmem:[%s3147_s4 + $0x30] sm:$0xff] }
 0x179   :  { %1135 = vst.msk [vmem:[#allocation2] sm:$0xff] %vm32_vm0, %v1102_v40  ;;  %v1103_v42 = vadd.f32 %v2129_v41, %v622_v38  ;;  %v629_v40 = vld [vmem:[#allocation2 + $0x40] sm:$0xff] }
 0x17b   :  { %1136 = vst.msk [vmem:[#allocation2 + $0x8] sm:$0xff] %vm32_vm0, %v1103_v42  ;;  %v2130_v46 = vpop.f32.mrb[4].mxu0  ;;  %v1209_v42 = vld [vmem:[%s3147_s4 + $0x38] sm:$0xff] }
 0x17c   :  { %v2131_v48 = vpop.f32.mrb[5].mxu0 }
 0x17d   :  { %v2132_v50 = vadd.f32 %v2131_v48, %v2130_v46  ;;  %v2133_v44 = vpop.f32.mrb[6].mxu0  ;;  %v1240_v48 = vmul.f32 0.1, %v1208_v33  ;;  %v1213_v33 = vld [vmem:[%s3147_s4 + $0x58] sm:$0xff] }
 0x17e   :  { %v2134_v52 = vpop.f32.mrb[7].mxu0 }
 0x17f   :  { %v1104_v53 = vadd.f32 %v2132_v50, %v623_v47  ;;  %v2135_v55 = vadd.f32 %v2134_v52, %v2133_v44 }
 0x180   :  { %v1170_v56 = vld [vmem:[#allocation2] sm:$0xff] }
 0x181   :  { %1137 = vst.msk [vmem:[#allocation2 + $0x10] sm:$0xff] %vm32_vm0, %v1104_v53  ;;  %v1105_v58 = vadd.f32 %v2135_v55, %v624_v51  ;;  %v1266_v59 = vadd.f32 %v1234_v45, %v1170_v56  ;;  %v1241_v51 = vmul.f32 0.1, %v1209_v42  ;;  %v1210_v56 = vld [vmem:[%s3147_s4 + $0x40] sm:$0xff]  ;;  %v634_v42 = vld [vmem:[#allocation2 + $0x68] sm:$0xff] }
 0x182   :  { %v1171_v62 = vld [vmem:[#allocation2 + $0x8] sm:$0xff] }
 0x183   :  { %1138 = vst.msk [vmem:[#allocation2 + $0x18] sm:$0xff] %vm32_vm0, %v1105_v58  ;;  %v2136_v0 = vpop.f32.mrb[8].mxu0  ;;  %v1298_v1 = vmax.f32 %v1266_v59, 0.0  ;;  %v1267_v2 = vadd.f32 %v1235_v37, %v1171_v62  ;;  %v645_v58 = vld [vmem:[#allocation2 + $0xc0] sm:$0xff] }
 0x184   :  { %v2137_v4 = vpop.f32.mrb[9].mxu0 }
 0x185   :  { %v2138_v6 = vadd.f32 %v2137_v4, %v2136_v0  ;;  %v2139_v7 = vpop.f32.mrb[10].mxu0  ;;  %2258 = vmatprep.mubr.msk.f32.mxu1 %vm32_vm0, %v1298_v1  ;;  %v1299_v8 = vmax.f32 %v1267_v2, 0.0  ;;  %v631_v0 = vld [vmem:[#allocation2 + $0x50] sm:$0xff] }
 0x186   :  { %v2140_v13 = vpop.f32.mrb[11].mxu0 }
 0x187   :  { %v1106_v11 = vadd.f32 %v2138_v6, %v625_v3  ;;  %v2141_v12 = vadd.f32 %v2140_v13, %v2139_v7  ;;  %2259 = vmatmul.mubr.msk.f32.vlgmr.msra.gmra.mrb[16].mxu1 %vm32_vm0, %v1299_v8  ;;  %v646_v6 = vld [vmem:[#allocation2 + $0xc8] sm:$0xff]  ;;  %v1242_v8 = vmul.f32 0.1, %v1210_v56 }
 0x188   :  { %v1172_v16 = vld [vmem:[#allocation2 + $0x10] sm:$0xff] }
 0x189   :  { %1139 = vst.msk [vmem:[#allocation2 + $0x20] sm:$0xff] %vm32_vm0, %v1106_v11  ;;  %v1107_v17 = vadd.f32 %v2141_v12, %v626_v10  ;;  %v1268_v54 = vadd.f32 %v1236_v9, %v1172_v16  ;;  %v1211_v9 = vld [vmem:[%s3147_s4 + $0x48] sm:$0xff]  ;;  %v632_v16 = vld [vmem:[#allocation2 + $0x58] sm:$0xff] }
 0x18a   :  { %v1173_v18 = vld [vmem:[#allocation2 + $0x18] sm:$0xff] }
 0x18b   :  { %1140 = vst.msk [vmem:[#allocation2 + $0x28] sm:$0xff] %vm32_vm0, %v1107_v17  ;;  %v2142_v57 = vpop.f32.mrb[12].mxu0  ;;  %v1300_v14 = vmax.f32 %v1268_v54, 0.0  ;;  %v1269_v23 = vadd.f32 %v1237_v15, %v1173_v18 }
 0x18c   :  { %v2143_v25 = vpop.f32.mrb[13].mxu0 }
 0x18d   :  { %v2144_v28 = vadd.f32 %v2143_v25, %v2142_v57  ;;  %v2145_v29 = vpop.f32.mrb[14].mxu0  ;;  %2261 = vmatprep.mubr.msk.f32.mxu1 %vm32_vm0, %v1300_v14  ;;  %v1301_v30 = vmax.f32 %v1269_v23, 0.0  ;;  %v1243_v57 = vmul.f32 0.1, %v1211_v9 }
 0x18e   :  { %v2146_v34 = vpop.f32.mrb[15].mxu0 }
 0x18f   :  { %v1108_v35 = vadd.f32 %v2144_v28, %v627_v24  ;;  %v2147_v60 = vadd.f32 %v2146_v34, %v2145_v29  ;;  %2262 = vmatmul.mubr.msk.f32.gmra.mrb[18].mxu1 %vm32_vm0, %v1301_v30  ;;  %v647_v28 = vld [vmem:[#allocation2 + $0xd0] sm:$0xff] }
 0x190   :  { %v1174_v20 = vld [vmem:[#allocation2 + $0x20] sm:$0xff] }
 0x191   :  { %1141 = vst.msk [vmem:[#allocation2 + $0x30] sm:$0xff] %vm32_vm0, %v1108_v35  ;;  %v1109_v21 = vadd.f32 %v2147_v60, %v628_v32  ;;  %v1270_v22 = vadd.f32 %v1238_v31, %v1174_v20  ;;  %v633_v32 = vld [vmem:[#allocation2 + $0x60] sm:$0xff] }
 0x192   :  { %v1175_v26 = vld [vmem:[#allocation2 + $0x28] sm:$0xff] }
 0x193   :  { %1142 = vst.msk [vmem:[#allocation2 + $0x38] sm:$0xff] %vm32_vm0, %v1109_v21  ;;  %v2148_v36 = vpop.f32.mrb[16].mxu0  ;;  %v1302_v38 = vmax.f32 %v1270_v22, 0.0  ;;  %v1271_v39 = vadd.f32 %v1239_v61, %v1175_v26  ;;  %v648_v21 = vld [vmem:[#allocation2 + $0xd8] sm:$0xff]  ;;  %v1244_v26 = vmul.f32 0.1, %v1212_v27 }
 0x194   :  { %v2149_v41 = vpop.f32.mrb[17].mxu0 }
 0x195   :  { %v2150_v43 = vadd.f32 %v2149_v41, %v2148_v36  ;;  %v2151_v46 = vpop.f32.mrb[18].mxu0  ;;  %2264 = vmatprep.mubr.msk.f32.mxu1 %vm32_vm0, %v1302_v38  ;;  %v1303_v47 = vmax.f32 %v1271_v39, 0.0 }
 0x196   :  { %v2152_v50 = vpop.f32.mrb[19].mxu0 }
 0x197   :  { %v1110_v44 = vadd.f32 %v2150_v43, %v629_v40  ;;  %v2153_v45 = vadd.f32 %v2152_v50, %v2151_v46  ;;  %2265 = vmatmul.mubr.msk.f32.gmra.mrb[20].mxu1 %vm32_vm0, %v1303_v47 }
 0x198   :  { %v1176_v52 = vld [vmem:[#allocation2 + $0x30] sm:$0xff] }
 0x199   :  { %1143 = vst.msk [vmem:[#allocation2 + $0x40] sm:$0xff] %vm32_vm0, %v1110_v44  ;;  %v1111_v53 = vadd.f32 %v2153_v45, %v630_v49  ;;  %v1272_v37 = vadd.f32 %v1240_v48, %v1176_v52  ;;  %v1245_v49 = vmul.f32 0.1, %v1213_v33  ;;  %v1214_v52 = vld [vmem:[%s3147_s4 + $0x60] sm:$0xff] }
 0x19a   :  { %v2196_v55 = vpop.f32.mrb[0].mxu1  ;;  %v1177_v62 = vld [vmem:[#allocation2 + $0x38] sm:$0xff] }
 0x19b   :  { %v2197_v59 = vpop.f32.mrb[1].mxu1  ;;  %1144 = vst.msk [vmem:[#allocation2 + $0x48] sm:$0xff] %vm32_vm0, %v1111_v53  ;;  %v2154_v63 = vpop.f32.mrb[20].mxu0  ;;  %v1304_v3 = vmax.f32 %v1272_v37, 0.0  ;;  %v1273_v4 = vadd.f32 %v1241_v51, %v1177_v62  ;;  %v649_v53 = vld [vmem:[#allocation2 + $0xe0] sm:$0xff] }
 0x19c   :  { %v2198_v1 = vadd.f32 %v2197_v59, %v2196_v55  ;;  %v2199_v2 = vpop.f32.mrb[2].mxu1  ;;  %v2155_v5 = vpop.f32.mrb[21].mxu0 }
 0x19d   :  { %v2200_v7 = vpop.f32.mrb[3].mxu1  ;;  %v2156_v10 = vadd.f32 %v2155_v5, %v2154_v63  ;;  %v2157_v11 = vpop.f32.mrb[22].mxu0  ;;  %2267 = vmatprep.mubr.msk.f32.mxu1 %vm32_vm0, %v1304_v3  ;;  %v1305_v15 = vmax.f32 %v1273_v4, 0.0  ;;  %v1246_v4 = vmul.f32 0.1, %v1214_v52  ;;  %v1215_v5 = vld [vmem:[%s3147_s4 + $0x68] sm:$0xff] }
 0x19e   :  { %v1126_v13 = vadd.f32 %v2198_v1, %v645_v58  ;;  %v2201_v12 = vadd.f32 %v2200_v7, %v2199_v2  ;;  %v2158_v17 = vpop.f32.mrb[23].mxu0  ;;  %v635_v58 = vld [vmem:[#allocation2 + $0x70] sm:$0xff]  ;;  %v650_v2 = vld [vmem:[#allocation2 + $0xe8] sm:$0xff] }
 0x19f   :  { %v1112_v54 = vadd.f32 %v2156_v10, %v631_v0  ;;  %v2159_v18 = vadd.f32 %v2158_v17, %v2157_v11  ;;  %2268 = vmatmul.mubr.msk.f32.gmra.mrb[22].mxu1 %vm32_vm0, %v1305_v15  ;;  %v1247_v17 = vmul.f32 0.1, %v1215_v5  ;;  %v639_v52 = vld [vmem:[#allocation2 + $0x90] sm:$0xff] }
 0x1a0   :  { %1159 = vst.msk [vmem:[#allocation2 + $0xc0] sm:$0xff] %vm32_vm0, %v1126_v13  ;;  %v1127_v19 = vadd.f32 %v2201_v12, %v646_v6  ;;  %v1178_v14 = vld [vmem:[#allocation2 + $0x40] sm:$0xff]  ;;  %v636_v13 = vld [vmem:[#allocation2 + $0x78] sm:$0xff] }
 0x1a1   :  { %1145 = vst.msk [vmem:[#allocation2 + $0x50] sm:$0xff] %vm32_vm0, %v1112_v54  ;;  %v1113_v23 = vadd.f32 %v2159_v18, %v632_v16  ;;  %v1274_v25 = vadd.f32 %v1242_v8, %v1178_v14  ;;  %v1216_v14 = vld [vmem:[%s3147_s4 + $0x70] sm:$0xff] }
 0x1a2   :  { %1160 = vst.msk [vmem:[#allocation2 + $0xc8] sm:$0xff] %vm32_vm0, %v1127_v19  ;;  %v2202_v24 = vpop.f32.mrb[4].mxu1  ;;  %v1179_v30 = vld [vmem:[#allocation2 + $0x48] sm:$0xff] }
 0x1a3   :  { %v2203_v29 = vpop.f32.mrb[5].mxu1  ;;  %1146 = vst.msk [vmem:[#allocation2 + $0x58] sm:$0xff] %vm32_vm0, %v1113_v23  ;;  %v2160_v31 = vpop.f32.mrb[24].mxu0  ;;  %v1306_v60 = vmax.f32 %v1274_v25, 0.0  ;;  %v1275_v61 = vadd.f32 %v1243_v57, %v1179_v30  ;;  %v651_v23 = vld [vmem:[#allocation2 + $0xf0] sm:$0xff] }
 0x1a4   :  { %v2204_v34 = vadd.f32 %v2203_v29, %v2202_v24  ;;  %v2205_v35 = vpop.f32.mrb[6].mxu1  ;;  %v2161_v20 = vpop.f32.mrb[25].mxu0 }
 0x1a5   :  { %v2206_v22 = vpop.f32.mrb[7].mxu1  ;;  %v2162_v36 = vadd.f32 %v2161_v20, %v2160_v31  ;;  %v2163_v39 = vpop.f32.mrb[26].mxu0  ;;  %2270 = vmatprep.mubr.msk.f32.mxu1 %vm32_vm0, %v1306_v60  ;;  %v1307_v41 = vmax.f32 %v1275_v61, 0.0  ;;  %v1248_v61 = vmul.f32 0.1, %v1216_v14  ;;  %v1217_v20 = vld [vmem:[%s3147_s4 + $0x78] sm:$0xff] }
 0x1a6   :  { %v1128_v38 = vadd.f32 %v2204_v34, %v647_v28  ;;  %v2207_v40 = vadd.f32 %v2206_v22, %v2205_v35  ;;  %v2164_v43 = vpop.f32.mrb[27].mxu0  ;;  %v637_v28 = vld [vmem:[#allocation2 + $0x80] sm:$0xff]  ;;  %v652_v35 = vld [vmem:[#allocation2 + $0xf8] sm:$0xff] }
 0x1a7   :  { %v1114_v46 = vadd.f32 %v2162_v36, %v633_v32  ;;  %v2165_v47 = vadd.f32 %v2164_v43, %v2163_v39  ;;  %2271 = vmatmul.mubr.msk.f32.gmra.mrb[24].mxu1 %vm32_vm0, %v1307_v41  ;;  %v1249_v43 = vmul.f32 0.1, %v1217_v20 }
 0x1a8   :  { %1161 = vst.msk [vmem:[#allocation2 + $0xd0] sm:$0xff] %vm32_vm0, %v1128_v38  ;;  %v1129_v48 = vadd.f32 %v2207_v40, %v648_v21  ;;  %v1180_v50 = vld [vmem:[#allocation2 + $0x50] sm:$0xff]  ;;  %v638_v38 = vld [vmem:[#allocation2 + $0x88] sm:$0xff] }
 0x1a9   :  { %1147 = vst.msk [vmem:[#allocation2 + $0x60] sm:$0xff] %vm32_vm0, %v1114_v46  ;;  %v1115_v44 = vadd.f32 %v2165_v47, %v634_v42  ;;  %v1276_v51 = vadd.f32 %v1244_v26, %v1180_v50  ;;  %v1218_v50 = vld [vmem:[%s3147_s4 + $0x80] sm:$0xff] }
 0x1aa   :  { %1162 = vst.msk [vmem:[#allocation2 + $0xd8] sm:$0xff] %vm32_vm0, %v1129_v48  ;;  %v2208_v45 = vpop.f32.mrb[8].mxu1  ;;  %v1181_v37 = vld [vmem:[#allocation2 + $0x58] sm:$0xff] }
 0x1ab   :  { %v2209_v55 = vpop.f32.mrb[9].mxu1  ;;  %1148 = vst.msk [vmem:[#allocation2 + $0x68] sm:$0xff] %vm32_vm0, %v1115_v44  ;;  %v2166_v56 = vpop.f32.mrb[28].mxu0  ;;  %v1308_v63 = vmax.f32 %v1276_v51, 0.0  ;;  %v1277_v0 = vadd.f32 %v1245_v49, %v1181_v37 }
 0x1ac   :  { %v2210_v59 = vadd.f32 %v2209_v55, %v2208_v45  ;;  %v2211_v62 = vpop.f32.mrb[10].mxu1  ;;  %v2167_v1 = vpop.f32.mrb[29].mxu0  ;;  %v1219_v55 = vld [vmem:[%s3147_s4 + $0x88] sm:$0xff] }
 0x1ad   :  { %v2212_v3 = vpop.f32.mrb[11].mxu1  ;;  %v2168_v6 = vadd.f32 %v2167_v1, %v2166_v56  ;;  %v2169_v8 = vpop.f32.mrb[30].mxu0  ;;  %2273 = vmatprep.mubr.msk.f32.mxu1 %vm32_vm0, %v1308_v63  ;;  %v1309_v10 = vmax.f32 %v1277_v0, 0.0 }
 0x1ae   :  { %v1130_v7 = vadd.f32 %v2210_v59, %v649_v53  ;;  %v2213_v9 = vadd.f32 %v2212_v3, %v2211_v62  ;;  %v2170_v11 = vpop.f32.mrb[31].mxu0  ;;  %v1250_v59 = vmul.f32 0.1, %v1218_v50  ;;  %v640_v62 = vld [vmem:[#allocation2 + $0x98] sm:$0xff] }
 0x1af   :  { %v1116_v12 = vadd.f32 %v2168_v6, %v635_v58  ;;  %v2171_v15 = vadd.f32 %v2170_v11, %v2169_v8  ;;  %2274 = vmatmul.mubr.msk.f32.gmra.mrb[26].mxu1 %vm32_vm0, %v1309_v10  ;;  %v1225_v50 = vld [vmem:[%s3147_s4 + $0xb8] sm:$0xff] }
 0x1b0   :  { %1163 = vst.msk [vmem:[#allocation2 + $0xe0] sm:$0xff] %vm32_vm0, %v1130_v7  ;;  %v1131_v16 = vadd.f32 %v2213_v9, %v650_v2  ;;  %v1182_v54 = vld [vmem:[#allocation2 + $0x60] sm:$0xff]  ;;  %v1251_v2 = vmul.f32 0.1, %v1219_v55  ;;  %v1220_v7 = vld [vmem:[%s3147_s4 + $0x90] sm:$0xff] }
 0x1b1   :  { %1149 = vst.msk [vmem:[#allocation2 + $0x70] sm:$0xff] %vm32_vm0, %v1116_v12  ;;  %v1117_v18 = vadd.f32 %v2171_v15, %v636_v13  ;;  %v1278_v57 = vadd.f32 %v1246_v4, %v1182_v54  ;;  %v641_v13 = vld [vmem:[#allocation2 + $0xa0] sm:$0xff]  ;;  %v1221_v12 = vld [vmem:[%s3147_s4 + $0x98] sm:$0xff]  ;;  %v1252_v54 = vmul.f32 0.1, %v1220_v7 }
 0x1b2   :  { %1164 = vst.msk [vmem:[#allocation2 + $0xe8] sm:$0xff] %vm32_vm0, %v1131_v16  ;;  %v2214_v19 = vpop.f32.mrb[12].mxu1  ;;  %v1183_v25 = vld [vmem:[#allocation2 + $0x68] sm:$0xff]  ;;  %v1194_v55 = vld [vmem:[#allocation2 + $0xc0] sm:$0xff] }
 0x1b3   :  { %v2215_v24 = vpop.f32.mrb[13].mxu1  ;;  %1150 = vst.msk [vmem:[#allocation2 + $0x78] sm:$0xff] %vm32_vm0, %v1117_v18  ;;  %v2172_v27 = vpop.f32.mrb[32].mxu0  ;;  %v1310_v31 = vmax.f32 %v1278_v57, 0.0  ;;  %v1279_v32 = vadd.f32 %v1247_v17, %v1183_v25  ;;  %v642_v18 = vld [vmem:[#allocation2 + $0xa8] sm:$0xff] }
 0x1b4   :  { %v2216_v29 = vadd.f32 %v2215_v24, %v2214_v19  ;;  %v2217_v30 = vpop.f32.mrb[14].mxu1  ;;  %v2173_v34 = vpop.f32.mrb[33].mxu0 }
 0x1b5   :  { %v2218_v60 = vpop.f32.mrb[15].mxu1  ;;  %v2174_v21 = vadd.f32 %v2173_v34, %v2172_v27  ;;  %v2175_v26 = vpop.f32.mrb[34].mxu0  ;;  %2276 = vmatprep.mubr.msk.f32.mxu1 %vm32_vm0, %v1310_v31  ;;  %v1311_v36 = vmax.f32 %v1279_v32, 0.0  ;;  %v643_v34 = vld [vmem:[#allocation2 + $0xb0] sm:$0xff] }
 0x1b6   :  { %v1132_v22 = vadd.f32 %v2216_v29, %v651_v23  ;;  %v2219_v33 = vadd.f32 %v2218_v60, %v2217_v30  ;;  %v2176_v39 = vpop.f32.mrb[35].mxu0  ;;  %v1253_v23 = vmul.f32 0.1, %v1221_v12  ;;  %v1222_v29 = vld [vmem:[%s3147_s4 + $0xa0] sm:$0xff]  ;;  %v1223_v60 = vld [vmem:[%s3147_s4 + $0xa8] sm:$0xff] }
 0x1b7   :  { %v1118_v40 = vadd.f32 %v2174_v21, %v637_v28  ;;  %v2177_v41 = vadd.f32 %v2176_v39, %v2175_v26  ;;  %2277 = vmatmul.mubr.msk.f32.gmra.mrb[28].mxu1 %vm32_vm0, %v1311_v36  ;;  %v644_v26 = vld [vmem:[#allocation2 + $0xb8] sm:$0xff]  ;;  %v1255_v39 = vmul.f32 0.1, %v1223_v60 }
 0x1b8   :  { %1165 = vst.msk [vmem:[#allocation2 + $0xf0] sm:$0xff] %vm32_vm0, %v1132_v22  ;;  %v1133_v42 = vadd.f32 %v2219_v33, %v652_v35  ;;  %v1184_v46 = vld [vmem:[#allocation2 + $0x70] sm:$0xff]  ;;  %v1254_v22 = vmul.f32 0.1, %v1222_v29 }
 0x1b9   :  { %1151 = vst.msk [vmem:[#allocation2 + $0x80] sm:$0xff] %vm32_vm0, %v1118_v40  ;;  %v1119_v47 = vadd.f32 %v2177_v41, %v638_v38  ;;  %v1280_v48 = vadd.f32 %v1248_v61, %v1184_v46  ;;  %v1224_v46 = vld [vmem:[%s3147_s4 + $0xb0] sm:$0xff] }
 0x1ba   :  { %1166 = vst.msk [vmem:[#allocation2 + $0xf8] sm:$0xff] %vm32_vm0, %v1133_v42  ;;  %v1185_v49 = vld [vmem:[#allocation2 + $0x78] sm:$0xff] }
 0x1bb   :  { %1152 = vst.msk [vmem:[#allocation2 + $0x88] sm:$0xff] %vm32_vm0, %v1119_v47  ;;  %v2178_v44 = vpop.f32.mrb[36].mxu0  ;;  %v1312_v45 = vmax.f32 %v1280_v48, 0.0  ;;  %v1281_v51 = vadd.f32 %v1249_v43, %v1185_v49  ;;  %v1226_v49 = vld [vmem:[%s3147_s4 + $0xc0] sm:$0xff] }
 0x1bc   :  { %v2179_v53 = vpop.f32.mrb[37].mxu0 }
 0x1bd   :  { %v2180_v37 = vadd.f32 %v2179_v53, %v2178_v44  ;;  %v2181_v56 = vpop.f32.mrb[38].mxu0  ;;  %2279 = vmatprep.mubr.msk.f32.mxu1 %vm32_vm0, %v1312_v45  ;;  %v1313_v58 = vmax.f32 %v1281_v51, 0.0  ;;  %v1256_v45 = vmul.f32 0.1, %v1224_v46  ;;  %v1258_v51 = vmul.f32 0.1, %v1226_v49 }
 0x1be   :  { %v2182_v63 = vpop.f32.mrb[39].mxu0  ;;  %v1257_v53 = vmul.f32 0.1, %v1225_v50 }
 0x1bf   :  { %v1120_v0 = vadd.f32 %v2180_v37, %v639_v52  ;;  %v2183_v1 = vadd.f32 %v2182_v63, %v2181_v56  ;;  %2280 = vmatmul.mubr.msk.f32.gmra.mrb[30].mxu1 %vm32_vm0, %v1313_v58  ;;  %v1227_v52 = vld [vmem:[%s3147_s4 + $0xc8] sm:$0xff]  ;;  %v1228_v37 = vld [vmem:[%s3147_s4 + $0xd0] sm:$0xff]  ;;  %v1290_v63 = vadd.f32 %v1258_v51, %v1194_v55 }
 0x1c0   :  { %v1186_v3 = vld [vmem:[#allocation2 + $0x80] sm:$0xff] }
 0x1c1   :  { %1153 = vst.msk [vmem:[#allocation2 + $0x90] sm:$0xff] %vm32_vm0, %v1120_v0  ;;  %v1121_v4 = vadd.f32 %v2183_v1, %v640_v62  ;;  %v1282_v5 = vadd.f32 %v1250_v59, %v1186_v3  ;;  %v1259_v59 = vmul.f32 0.1, %v1227_v52  ;;  %v1195_v0 = vld [vmem:[#allocation2 + $0xc8] sm:$0xff]  ;;  %v1260_v1 = vmul.f32 0.1, %v1228_v37 }
 0x1c2   :  { %v1187_v6 = vld [vmem:[#allocation2 + $0x88] sm:$0xff] }
 0x1c3   :  { %1154 = vst.msk [vmem:[#allocation2 + $0x98] sm:$0xff] %vm32_vm0, %v1121_v4  ;;  %v2184_v8 = vpop.f32.mrb[40].mxu0  ;;  %v1314_v9 = vmax.f32 %v1282_v5, 0.0  ;;  %v1283_v10 = vadd.f32 %v1251_v2, %v1187_v6  ;;  %v1229_v2 = vld [vmem:[%s3147_s4 + $0xd8] sm:$0xff]  ;;  %v1196_v5 = vld [vmem:[#allocation2 + $0xd0] sm:$0xff]  ;;  %v1230_v6 = vld [vmem:[%s3147_s4 + $0xe0] sm:$0xff] }
 0x1c4   :  { %v2185_v11 = vpop.f32.mrb[41].mxu0  ;;  %v1262_v12 = vmul.f32 0.1, %v1230_v6 }
 0x1c5   :  { %v2186_v15 = vadd.f32 %v2185_v11, %v2184_v8  ;;  %v2187_v16 = vpop.f32.mrb[42].mxu0  ;;  %2282 = vmatprep.mubr.msk.f32.mxu1 %vm32_vm0, %v1314_v9  ;;  %v1315_v17 = vmax.f32 %v1283_v10, 0.0  ;;  %v1291_v8 = vadd.f32 %v1259_v59, %v1195_v0  ;;  %v1261_v9 = vmul.f32 0.1, %v1229_v2  ;;  %v1197_v11 = vld [vmem:[#allocation2 + $0xd8] sm:$0xff] }
 0x1c6   :  { %v2188_v19 = vpop.f32.mrb[43].mxu0  ;;  %v1322_v10 = vmax.f32 %v1290_v63, 0.0 }
 0x1c7   :  { %v1122_v57 = vadd.f32 %v2186_v15, %v641_v13  ;;  %v2189_v14 = vadd.f32 %v2188_v19, %v2187_v16  ;;  %2283 = vmatmul.mubr.msk.f32.gmra.mrb[32].mxu1 %vm32_vm0, %v1315_v17  ;;  %v1292_v13 = vadd.f32 %v1260_v1, %v1196_v5  ;;  %v1231_v15 = vld [vmem:[%s3147_s4 + $0xe8] sm:$0xff]  ;;  %v1198_v16 = vld [vmem:[#allocation2 + $0xe0] sm:$0xff]  ;;  %v1232_v17 = vld [vmem:[%s3147_s4 + $0xf0] sm:$0xff] }
 0x1c8   :  { %v1188_v24 = vld [vmem:[#allocation2 + $0x90] sm:$0xff]  ;;  %v1263_v19 = vmul.f32 0.1, %v1231_v15 }
 0x1c9   :  { %1155 = vst.msk [vmem:[#allocation2 + $0xa0] sm:$0xff] %vm32_vm0, %v1122_v57  ;;  %v1123_v25 = vadd.f32 %v2189_v14, %v642_v18  ;;  %v1284_v27 = vadd.f32 %v1252_v54, %v1188_v24  ;;  %v1323_v54 = vmax.f32 %v1291_v8, 0.0  ;;  %v1293_v18 = vadd.f32 %v1261_v9, %v1197_v11 }
 0x1ca   :  { %v1189_v28 = vld [vmem:[#allocation2 + $0x98] sm:$0xff]  ;;  %v1324_v57 = vmax.f32 %v1292_v13, 0.0  ;;  %v1294_v14 = vadd.f32 %v1262_v12, %v1198_v16  ;;  %v1264_v24 = vmul.f32 0.1, %v1232_v17 }
 0x1cb   :  { %1156 = vst.msk [vmem:[#allocation2 + $0xa8] sm:$0xff] %vm32_vm0, %v1123_v25  ;;  %v2190_v30 = vpop.f32.mrb[44].mxu0  ;;  %v1316_v31 = vmax.f32 %v1284_v27, 0.0  ;;  %v1285_v32 = vadd.f32 %v1253_v23, %v1189_v28  ;;  %v1199_v23 = vld [vmem:[#allocation2 + $0xe8] sm:$0xff]  ;;  %v1233_v25 = vld [vmem:[%s3147_s4 + $0xf8] sm:$0xff]  ;;  %v1200_v27 = vld [vmem:[#allocation2 + $0xf0] sm:$0xff] }
 0x1cc   :  { %v2191_v35 = vpop.f32.mrb[45].mxu0  ;;  %v1325_v28 = vmax.f32 %v1293_v18, 0.0  ;;  %v1295_v29 = vadd.f32 %v1263_v19, %v1199_v23 }
 0x1cd   :  { %v2192_v61 = vadd.f32 %v2191_v35, %v2190_v30  ;;  %v2193_v20 = vpop.f32.mrb[46].mxu0  ;;  %2285 = vmatprep.mubr.msk.f32.mxu1 %vm32_vm0, %v1316_v31  ;;  %v1317_v21 = vmax.f32 %v1285_v32, 0.0  ;;  %v1265_v30 = vmul.f32 0.1, %v1233_v25  ;;  %v1326_v31 = vmax.f32 %v1294_v14, 0.0 }
 0x1ce   :  { %v2194_v33 = vpop.f32.mrb[47].mxu0  ;;  %v1296_v32 = vadd.f32 %v1264_v24, %v1200_v27  ;;  %v1327_v35 = vmax.f32 %v1295_v29, 0.0 }
 0x1cf   :  { %v1124_v36 = vadd.f32 %v2192_v61, %v643_v34  ;;  %v2195_v38 = vadd.f32 %v2194_v33, %v2193_v20  ;;  %2286 = vmatmul.mubr.msk.f32.gmra.mrb[34].mxu1 %vm32_vm0, %v1317_v21  ;;  %v1201_v34 = vld [vmem:[#allocation2 + $0xf8] sm:$0xff]  ;;  %v3097_v21 = vld [vmem:[%s3149_s6] ss:$0 sm:$0xff]  ;;  %s2439_s6 = smov [#allocation3]  }
 0x1d0   :  { %v1190_v40 = vld [vmem:[#allocation2 + $0xa0] sm:$0xff]  ;;  %v1297_v60 = vadd.f32 %v1265_v30, %v1201_v34  ;;  %v1328_v61 = vmax.f32 %v1296_v32, 0.0  ;;  %s1825_s26 = sshll.u32 %s2439_s6, 4  ;;  %s1826_s26 = int_to_ptr.vmem [resolvable:$true] %s1825_s26 }
 0x1d1   :  { %1157 = vst.msk [vmem:[#allocation2 + $0xb0] sm:$0xff] %vm32_vm0, %v1124_v36  ;;  %v1125_v41 = vadd.f32 %v2195_v38, %v644_v26  ;;  %v1286_v42 = vadd.f32 %v1254_v22, %v1190_v40  ;;  %s2413_s27 = scalar_lea.vmem %s1826_s26, 2048  ;;  %p2418_p1 = scmp.lt.s32.totalorder %s1826_s26, %s1826_s26 }
 0x1d2   :  { %v1191_v43 = vld [vmem:[#allocation2 + $0xa8] sm:$0xff]  ;;  %v1329_v20 = vmax.f32 %v1297_v60, 0.0  ;;  %p2414_p0 = scmp.ne.s32.totalorder %s1826_s26, %s2413_s27  ;;  %p2419_p2 = scmp.lt.s32.totalorder %s2413_s27, %s2413_s27 }
 0x1d3   :  { %1158 = vst.msk [vmem:[#allocation2 + $0xb8] sm:$0xff] %vm32_vm0, %v1125_v41  ;;  %v1318_v47 = vmax.f32 %v1286_v42, 0.0  ;;  %v1287_v48 = vadd.f32 %v1255_v39, %v1191_v43 }
 0x1d4   :  { %p2420_p3 = por %p2419_p2, %p2418_p1 }
 0x1d5   :  { %2288 = vmatprep.mubr.msk.f32.mxu1 %vm32_vm0, %v1318_v47  ;;  %v1319_v44 = vmax.f32 %v1287_v48, 0.0 }
 0x1d6   :  { %p2421_p4 = pnand %p2420_p3, %p2414_p0 }
 0x1d7   :  { %2289 = vmatmul.mubr.msk.f32.gmra.mrb[36].mxu1 %vm32_vm0, %v1319_v44 }
 0x1d8   :  { %v1192_v56 = vld [vmem:[#allocation2 + $0xb0] sm:$0xff] }
 0x1d9   :  { %v1288_v58 = vadd.f32 %v1256_v45, %v1192_v56 }
 0x1da   :  { %v1193_v62 = vld [vmem:[#allocation2 + $0xb8] sm:$0xff] }
 0x1db   :  { %v1320_v3 = vmax.f32 %v1288_v58, 0.0  ;;  %v1289_v4 = vadd.f32 %v1257_v53, %v1193_v62 }
 0x1dd   :  { %2291 = vmatprep.mubr.msk.f32.mxu1 %vm32_vm0, %v1320_v3  ;;  %v1321_v7 = vmax.f32 %v1289_v4, 0.0 }
 0x1df   :  { %2292 = vmatmul.mubr.msk.f32.gmra.mrb[38].mxu1 %vm32_vm0, %v1321_v7 }
 0x1e0   :  { %2294 = vmatprep.mubr.msk.f32.mxu1 %vm32_vm0, %v1322_v10 }
 0x1e3   :  { %2295 = vmatmul.mubr.msk.f32.gmra.mrb[40].mxu1 %vm32_vm0, %v1323_v54 }
 0x1e4   :  { %2297 = vmatprep.mubr.msk.f32.mxu1 %vm32_vm0, %v1324_v57 }
 0x1e7   :  { %2298 = vmatmul.mubr.msk.f32.gmra.mrb[42].mxu1 %vm32_vm0, %v1325_v28 }
 0x1e8   :  { %2300 = vmatprep.mubr.msk.f32.mxu1 %vm32_vm0, %v1326_v31 }
 0x1eb   :  { %2301 = vmatmul.mubr.msk.f32.gmra.mrb[44].mxu1 %vm32_vm0, %v1327_v35 }
 0x1ec   :  { %2303 = vmatprep.mubr.msk.f32.mxu1 %vm32_vm0, %v1328_v61 }
 0x1ef   :  { %2304 = vmatmul.mubr.msk.f32.gmra.mrb[46].mxu1 %vm32_vm0, %v1329_v20 }
 0x25a   :  { %v2260_v22 = vpop.f32.mrb[16].mxu1 }
 0x25b   :  { %v1507_v26 = vadd.f32 %v2260_v22, %v3097_v21  ;;  %v1501_v33 = vpop.f32.mrb[17].mxu1 }
 0x25c   :  { %v1502_v36 = vadd.f32 %v3097_v21, %v1501_v33 }
 0x25e   :  { %v2016_v38 = vpack.c.bf16 %v1507_v26, %v1502_v36 }
 0x260   :  { %2017 = vst [vmem:[#allocation3] sm:$0xff] %v2016_v38  }
 0x262   :  { %v2263_v39 = vpop.f32.mrb[18].mxu1 }
 0x263   :  { %v1517_v40 = vadd.f32 %v2263_v39, %v3097_v21  ;;  %v1511_v41 = vpop.f32.mrb[19].mxu1 }
 0x264   :  { %v1512_v42 = vadd.f32 %v3097_v21, %v1511_v41 }
 0x266   :  { %v2021_v43 = vpack.c.bf16 %v1517_v40, %v1512_v42 }
 0x268   :  { %2093 = vst [vmem:[#allocation3 + $0x8] sm:$0xff] %v2021_v43  }
 0x26a   :  { %v2266_v46 = vpop.f32.mrb[20].mxu1 }
 0x26b   :  { %v1527_v47 = vadd.f32 %v2266_v46, %v3097_v21  ;;  %v1521_v48 = vpop.f32.mrb[21].mxu1 }
 0x26c   :  { %v1522_v49 = vadd.f32 %v3097_v21, %v1521_v48 }
 0x26e   :  { %v2026_v50 = vpack.c.bf16 %v1527_v47, %v1522_v49 }
 0x270   :  { %2094 = vst [vmem:[#allocation3 + $0x10] sm:$0xff] %v2026_v50  }
 0x272   :  { %v2269_v44 = vpop.f32.mrb[22].mxu1 }
 0x273   :  { %v1537_v45 = vadd.f32 %v2269_v44, %v3097_v21  ;;  %v1531_v51 = vpop.f32.mrb[23].mxu1 }
 0x274   :  { %v1532_v52 = vadd.f32 %v3097_v21, %v1531_v51 }
 0x276   :  { %v2031_v53 = vpack.c.bf16 %v1537_v45, %v1532_v52 }
 0x278   :  { %2095 = vst [vmem:[#allocation3 + $0x18] sm:$0xff] %v2031_v53  }
 0x27a   :  { %v2272_v55 = vpop.f32.mrb[24].mxu1 }
 0x27b   :  { %v1547_v37 = vadd.f32 %v2272_v55, %v3097_v21  ;;  %v1541_v56 = vpop.f32.mrb[25].mxu1 }
 0x27c   :  { %v1542_v58 = vadd.f32 %v3097_v21, %v1541_v56 }
 0x27e   :  { %v2036_v59 = vpack.c.bf16 %v1547_v37, %v1542_v58 }
 0x280   :  { %2096 = vst [vmem:[#allocation3 + $0x20] sm:$0xff] %v2036_v59  }
 0x282   :  { %v2275_v62 = vpop.f32.mrb[26].mxu1 }
 0x283   :  { %v1557_v63 = vadd.f32 %v2275_v62, %v3097_v21  ;;  %v1551_v0 = vpop.f32.mrb[27].mxu1 }
 0x284   :  { %v1552_v1 = vadd.f32 %v3097_v21, %v1551_v0 }
 0x286   :  { %v2041_v2 = vpack.c.bf16 %v1557_v63, %v1552_v1 }
 0x288   :  { %2097 = vst [vmem:[#allocation3 + $0x28] sm:$0xff] %v2041_v2  }
 0x28a   :  { %v2278_v3 = vpop.f32.mrb[28].mxu1 }
 0x28b   :  { %v1567_v4 = vadd.f32 %v2278_v3, %v3097_v21  ;;  %v1561_v5 = vpop.f32.mrb[29].mxu1 }
 0x28c   :  { %v1562_v6 = vadd.f32 %v3097_v21, %v1561_v5 }
 0x28e   :  { %v2046_v7 = vpack.c.bf16 %v1567_v4, %v1562_v6 }
 0x290   :  { %2098 = vst [vmem:[#allocation3 + $0x30] sm:$0xff] %v2046_v7  }
 0x292   :  { %v2281_v8 = vpop.f32.mrb[30].mxu1 }
 0x293   :  { %v1577_v9 = vadd.f32 %v2281_v8, %v3097_v21  ;;  %v1571_v10 = vpop.f32.mrb[31].mxu1 }
 0x294   :  { %v1572_v13 = vadd.f32 %v3097_v21, %v1571_v10 }
 0x296   :  { %v2051_v11 = vpack.c.bf16 %v1577_v9, %v1572_v13 }
 0x298   :  { %2099 = vst [vmem:[#allocation3 + $0x38] sm:$0xff] %v2051_v11  }
 0x29a   :  { %v2284_v12 = vpop.f32.mrb[32].mxu1 }
 0x29b   :  { %v1587_v15 = vadd.f32 %v2284_v12, %v3097_v21  ;;  %v1581_v16 = vpop.f32.mrb[33].mxu1 }
 0x29c   :  { %v1582_v17 = vadd.f32 %v3097_v21, %v1581_v16 }
 0x29e   :  { %v2056_v54 = vpack.c.bf16 %v1587_v15, %v1582_v17 }
 0x2a0   :  { %2100 = vst [vmem:[#allocation3 + $0x40] sm:$0xff] %v2056_v54  }
 0x2a2   :  { %v2287_v18 = vpop.f32.mrb[34].mxu1 }
 0x2a3   :  { %v1597_v19 = vadd.f32 %v2287_v18, %v3097_v21  ;;  %v1591_v57 = vpop.f32.mrb[35].mxu1 }
 0x2a4   :  { %v1592_v14 = vadd.f32 %v3097_v21, %v1591_v57 }
 0x2a6   :  { %v2061_v23 = vpack.c.bf16 %v1597_v19, %v1592_v14 }
 0x2a8   :  { %2101 = vst [vmem:[#allocation3 + $0x48] sm:$0xff] %v2061_v23  }
 0x2aa   :  { %v2290_v24 = vpop.f32.mrb[36].mxu1 }
 0x2ab   :  { %v1607_v25 = vadd.f32 %v2290_v24, %v3097_v21  ;;  %v1601_v27 = vpop.f32.mrb[37].mxu1 }
 0x2ac   :  { %v1602_v28 = vadd.f32 %v3097_v21, %v1601_v27 }
 0x2ae   :  { %v2066_v29 = vpack.c.bf16 %v1607_v25, %v1602_v28 }
 0x2b0   :  { %2102 = vst [vmem:[#allocation3 + $0x50] sm:$0xff] %v2066_v29  }
 0x2b2   :  { %v2293_v30 = vpop.f32.mrb[38].mxu1 }
 0x2b3   :  { %v1617_v31 = vadd.f32 %v2293_v30, %v3097_v21  ;;  %v1611_v32 = vpop.f32.mrb[39].mxu1 }
 0x2b4   :  { %v1612_v34 = vadd.f32 %v3097_v21, %v1611_v32 }
 0x2b6   :  { %v2071_v35 = vpack.c.bf16 %v1617_v31, %v1612_v34  ;;  %v2296_v60 = vpop.f32.mrb[40].mxu1 }
 0x2b7   :  { %v1627_v61 = vadd.f32 %v2296_v60, %v3097_v21  ;;  %v1621_v20 = vpop.f32.mrb[41].mxu1 }
 0x2b8   :  { %2103 = vst [vmem:[#allocation3 + $0x58] sm:$0xff] %v2071_v35   ;;  %v1622_v22 = vadd.f32 %v3097_v21, %v1621_v20 }
 0x2ba   :  { %v2076_v26 = vpack.c.bf16 %v1627_v61, %v1622_v22  ;;  %v2299_v33 = vpop.f32.mrb[42].mxu1 }
 0x2bb   :  { %v1637_v36 = vadd.f32 %v2299_v33, %v3097_v21  ;;  %v1631_v38 = vpop.f32.mrb[43].mxu1 }
 0x2bc   :  { %2104 = vst [vmem:[#allocation3 + $0x60] sm:$0xff] %v2076_v26   ;;  %v1632_v39 = vadd.f32 %v3097_v21, %v1631_v38 }
 0x2be   :  { %v2081_v40 = vpack.c.bf16 %v1637_v36, %v1632_v39  ;;  %v2302_v41 = vpop.f32.mrb[44].mxu1 }
 0x2bf   :  { %v1647_v42 = vadd.f32 %v2302_v41, %v3097_v21  ;;  %v1641_v43 = vpop.f32.mrb[45].mxu1 }
 0x2c0   :  { %2105 = vst [vmem:[#allocation3 + $0x68] sm:$0xff] %v2081_v40   ;;  %v1642_v46 = vadd.f32 %v3097_v21, %v1641_v43 }
 0x2c2   :  { %v2086_v47 = vpack.c.bf16 %v1647_v42, %v1642_v46  ;;  %v2305_v48 = vpop.f32.mrb[46].mxu1 }
 0x2c3   :  { %v1657_v49 = vadd.f32 %v2305_v48, %v3097_v21  ;;  %v1651_v50 = vpop.f32.mrb[47].mxu1 }
 0x2c4   :  { %2106 = vst [vmem:[#allocation3 + $0x70] sm:$0xff] %v2086_v47   ;;  %v1652_v44 = vadd.f32 %v3097_v21, %v1651_v50 }
 0x2c6   :  { %v2091_v45 = vpack.c.bf16 %v1657_v49, %v1652_v44 }
 0x2c8   :  { %2107 = vst [vmem:[#allocation3 + $0x78] sm:$0xff] %v2091_v45  }
 0x2c9   :  { %2424 = shalt.err (!%p2421_p4)
}
 0x2ca   :  { %s2425_s3 = scalar_lea.hbm %s3150_s7, 2048 }
 0x2cb   :  { %p2426_p5 = scmp.ne.s32.totalorder %s3150_s7, %s2425_s3  ;;  %p2429_p6 = scmp.lt.u32.totalorder %s2425_s3, %s3150_s7 }
 0x2cd   :  { %p2431_p7 = pnand %p2429_p6, %p2426_p5 }
 0x2cf   :  { %2434 = shalt.err (!%p2431_p7)
}
 0x2d0   :  { %s2440_s10 = smov 64   ;;  %s2441_s11 = smov 4  }
 0x2d1   :  { %1831 = dma.vmem_to_hbm [thread:$0]  %s1826_s26, 2048, %s3150_s7, [#allocation4], %s2440_s10, %s2440_s10, %s2441_s11  }
 0x2d2   :  { %2435 = dma.done.wait [#allocation4], 2048  }
 0x2d3   :  { %2436 = vsyncadd [#allocation4], 4294965248 }
 0x2d4   :  { %1835 = vsyncpa [#allocation4], 1 }

</bundles_post_ra>
